<compile_context>
chip_gen: v7x
topology: tpu7x:2x2x1
jax: 0.10.0
libtpu: 0.0.40
codegen_flags: <defaults>
</compile_context>

<pallas_src>
import functools

import jax
import jax.numpy as jnp
from jax import lax
from jax.experimental import pallas as pl
from jax.experimental.pallas import tpu as pltpu


# ---------------------------------------------------------------------------
# Pallas kernel: one flow block (ActNorm+InvConv+start fused, WN, end, coupling)
# per grid step; grid = (batch, n_blocks).
# ---------------------------------------------------------------------------
def _flow_block_kernel(x_ref, m_ref,
                       bigw_ref, bigb_ref, inw_ref, inb_ref,
                       rsw_ref, rsb_ref, endw_ref, endb_ref,
                       z_ref, ld_ref,
                       xs_ref, lds_ref,
                       *, n_half, hidden, n_layers, ksize,
                       dilation_rate, sigmoid_scale, compute_dtype):
    f32 = jnp.float32
    cdt = compute_dtype
    C = 2 * n_half
    blk = pl.program_id(1)
    n_blk = pl.num_programs(1)

    mb = m_ref[0]                                    # (1, T) f32
    T = mb.shape[-1]

    @pl.when(blk == 0)
    def _init():
        xs_ref[...] = x_ref[0].astype(f32)           # load input state once per batch
        lds_ref[...] = jnp.zeros_like(lds_ref)

    xb = xs_ref[...]                                 # (C, T) f32 persistent state

    # --- fused ActNorm + InvConvNear + WN `start` 1x1 conv: one matmul --------
    y = (jnp.dot(bigw_ref[...].astype(cdt), xb.astype(cdt),
                 preferred_element_type=f32) + bigb_ref[...]) * mb      # (C+H, T)
    x0 = y[:n_half]                                  # z0 (kept unchanged)
    x1 = y[n_half:C]
    h = y[C:]                                        # (H, T) WN state (already masked)

    # --- WaveNet core ----------------------------------------------------------
    def dilated_conv(i, d, h_f32):
        # Zero-padded dilated conv via K roll-shifted matmuls.
        # Valid because h is zero in all lanes >= T_valid and T_pad >= T_valid + pad.
        pad = (ksize * d - d) // 2
        acc = jnp.zeros((2 * hidden, T), f32)
        for k in range(ksize):
            s = (pad - k * d) % T                    # static, non-negative
            hk = h_f32 if s == 0 else pltpu.roll(h_f32, s, axis=1)
            acc = acc + jnp.dot(inw_ref[i * ksize + k].astype(cdt), hk.astype(cdt),
                                preferred_element_type=f32)
        return acc + inb_ref[i]

    def wn_layer(i, d, h, out):
        x_in = dilated_conv(i, d, h)
        acts = jnp.tanh(x_in[:hidden]) * jax.nn.sigmoid(x_in[hidden:])
        rs = jnp.dot(rsw_ref[i].astype(cdt), acts.astype(cdt),
                     preferred_element_type=f32) + rsb_ref[i]
        h = (h + rs[:hidden]) * mb                   # per-layer mask (WN reference semantics)
        out = out + rs[hidden:]
        return h, out

    out = jnp.zeros((hidden, T), f32)
    if dilation_rate == 1 and n_layers > 2:
        # fori_loop (dynamic weight indexing): bounds live ranges for deep WN stacks.
        h, out = lax.fori_loop(0, n_layers - 1,
                               lambda i, c: wn_layer(i, 1, c[0], c[1]), (h, out))
    else:
        for i in range(n_layers - 1):
            h, out = wn_layer(i, dilation_rate ** i, h, out)

    # Last WN layer: skip-only, uses only the (H, H) half of its res/skip weight.
    i_last = n_layers - 1
    d_last = dilation_rate ** i_last
    x_in = dilated_conv(i_last, d_last, h)
    acts = jnp.tanh(x_in[:hidden]) * jax.nn.sigmoid(x_in[hidden:])
    out = out + (jnp.dot(rsw_ref[i_last][:hidden].astype(cdt), acts.astype(cdt),
                         preferred_element_type=f32) + rsb_ref[i_last][:hidden])
    out = out * mb                                   # WN output mask

    # --- `end` 1x1 conv + affine coupling --------------------------------------
    o = jnp.dot(endw_ref[...].astype(cdt), out.astype(cdt),
                preferred_element_type=f32) + endb_ref[...]
    m_coef = o[:n_half]
    logs = o[n_half:]
    if sigmoid_scale:
        logs = jnp.log(1e-6 + jax.nn.sigmoid(logs + 2.0))
    z1 = (m_coef + jnp.exp(logs) * x1) * mb

    # coupling logdet (only data-dependent logdet term left in-kernel)
    lds_ref[...] = lds_ref[...] + jnp.sum(
        jnp.sum(logs * mb, axis=1, keepdims=True), axis=0, keepdims=True)

    @pl.when(blk < n_blk - 1)
    def _store_state():                              # half-writes, no concat
        xs_ref[:n_half, :] = x0
        xs_ref[n_half:, :] = z1

    @pl.when(blk == n_blk - 1)
    def _store_out():
        z_ref[0, :n_half, :] = x0.astype(z_ref.dtype)
        z_ref[0, n_half:, :] = z1.astype(z_ref.dtype)
        ld_ref[0] = lds_ref[...]


# ---------------------------------------------------------------------------
# pallas_call wrapper
# ---------------------------------------------------------------------------
def _wspec(arr):
    """Per-flow-block weight: leading block dim squeezed, indexed by grid axis 1."""
    nrest = arr.ndim - 1
    return pl.BlockSpec((None,) + tuple(arr.shape[1:]),
                        lambda b, k, _n=nrest: (k,) + (0,) * _n)


def fused_flow_forward(x, x_mask, packed, cfg, compute_dtype):
    B, C, T = x.shape
    NB = cfg["n_blocks"]
    kern = functools.partial(
        _flow_block_kernel,
        n_half=C // 2, hidden=cfg["hidden_channels"],
        n_layers=cfg["n_layers"], ksize=cfg["kernel_size"],
        dilation_rate=cfg["dilation_rate"], sigmoid_scale=cfg["sigmoid_scale"],
        compute_dtype=compute_dtype)

    names = ["big_w", "big_b", "in_w", "in_b", "rs_w", "rs_b", "end_w", "end_b"]
    extras = [packed[n] for n in names]

    in_specs = [pl.BlockSpec((1, C, T), lambda b, k: (b, 0, 0)),
                pl.BlockSpec((1, 1, T), lambda b, k: (b, 0, 0))]
    in_specs += [_wspec(a) for a in extras]

    z, ld = pl.pallas_call(
        kern,
        out_shape=(jax.ShapeDtypeStruct((B, C, T), x.dtype),
                   jax.ShapeDtypeStruct((B, 1, 1), jnp.float32)),
        grid=(B, NB),
        in_specs=in_specs,
        out_specs=(pl.BlockSpec((1, C, T), lambda b, k: (b, 0, 0)),
                   pl.BlockSpec((1, 1, 1), lambda b, k: (b, 0, 0))),
        scratch_shapes=[pltpu.VMEM((C, T), jnp.float32),   # persistent x state
                        pltpu.VMEM((1, 1), jnp.float32)],  # running coupling logdet
        compiler_params=pltpu.CompilerParams(
            dimension_semantics=("parallel", "arbitrary"),
            vmem_limit_bytes=48 * 1024 * 1024),
    )(x, x_mask, *extras)
    return z, ld.reshape(B)


# ---------------------------------------------------------------------------
# Plain-JAX glue: squeeze / unsqueeze, parameter packing, time padding
# ---------------------------------------------------------------------------
def squeeze(x, x_mask, n_sqz):
    B, C, T = x.shape
    t = (T // n_sqz) * n_sqz
    x = x[:, :, :t]
    x_sqz = x.reshape(B, C, t // n_sqz, n_sqz)
    x_sqz = jnp.transpose(x_sqz, (0, 3, 1, 2)).reshape(B, C * n_sqz, t // n_sqz)
    x_mask = x_mask[:, :, n_sqz - 1::n_sqz]
    return x_sqz * x_mask, x_mask


def unsqueeze(x, x_mask, n_sqz):
    B, C, T = x.shape
    x_unsqz = x.reshape(B, n_sqz, C // n_sqz, T)
    x_unsqz = jnp.transpose(x_unsqz, (0, 2, 3, 1)).reshape(B, C // n_sqz, T * n_sqz)
    x_mask = jnp.repeat(x_mask[:, :, :, None], n_sqz, axis=3).reshape(B, 1, T * n_sqz)
    return x_unsqz * x_mask, x_mask


def invconv_mixing(W, C, n_split):
    """Fold InvConvNear's view/permute/conv2d/permute/view into one CxC matmul."""
    half = n_split // 2
    c_idx = jnp.arange(C)
    g = c_idx // (C // 2)
    r = c_idx % (C // 2)
    q = r // half                 # "column" index (untouched by the conv)
    s = r % half
    p = g * half + s              # split index mixed by W
    mix = W[p[:, None], p[None, :]] * (q[:, None] == q[None, :]).astype(W.dtype)
    # NOTE: det(W) > 0 by construction (matches torch.logdet on the module's init);
    # a loaded checkpoint with det(W) < 0 would silently drop the sign here.
    _, logabs = jnp.linalg.slogdet(W)
    return mix.astype(jnp.float32), logabs.astype(jnp.float32)


def pack_params(params, cfg, compute_dtype=jnp.bfloat16):
    """Fold ActNorm+InvConv+start into one (C+H,C) matmul per block; stack weights.

    NOTE(bf16 path): big_w (incl. the folded exp(logs_a) scale) is rounded to bf16
    while the host-side logdet constant uses the f32 weights; the density is very
    slightly inconsistent with the transform (fine for inference).
    """
    C = cfg["in_channels"] * cfg["n_sqz"]
    H, K, L = cfg["hidden_channels"], cfg["kernel_size"], cfg["n_layers"]
    n_half = C // 2
    wdt = compute_dtype
    blocks = params["blocks"]
    NB = len(blocks)

    big_w, big_b = [], []
    ld_const = jnp.float32(0.0)
    for b in blocks:
        mix, logabs = invconv_mixing(b["invconv_w"], C, cfg["n_split"])
        logs_a, bias_a = b["actnorm_logs"], b["actnorm_bias"]
        A = mix * jnp.exp(logs_a).reshape(1, C)        # fold ActNorm scale (columns)
        cvec = mix @ bias_a                            # fold ActNorm bias      (C, 1)
        cp = b["coupling"]
        S, sb = cp["start_w"], cp["start_b"]           # (H, C/2), (H, 1)
        big_w.append(jnp.concatenate([A, S @ A[:n_half]], axis=0))          # (C+H, C)
        big_b.append(jnp.concatenate([cvec, S @ cvec[:n_half] + sb], axis=0))
        ld_const = ld_const + jnp.sum(logs_a) + logabs * (float(C) / cfg["n_split"])

    cpl = [b["coupling"] for b in blocks]
    in_w = jnp.stack([p["in_w"] for p in cpl])                 # (NB, L, K, 2H, H)
    in_w = in_w.reshape(NB, L * K, 2 * H, H)                   # index = layer*K + tap

    return dict(
        big_w=jnp.stack(big_w).astype(wdt),                    # (NB, C+H, C)
        big_b=jnp.stack(big_b).astype(jnp.float32),            # (NB, C+H, 1)
        in_w=in_w.astype(wdt),                                 # (NB, L*K, 2H, H)
        in_b=jnp.stack([p["in_b"] for p in cpl]).astype(jnp.float32),   # (NB, L, 2H, 1)
        rs_w=jnp.stack([p["rs_w"] for p in cpl]).astype(wdt),           # (NB, L, 2H, H)
        rs_b=jnp.stack([p["rs_b"] for p in cpl]).astype(jnp.float32),
        end_w=jnp.stack([p["end_w"] for p in cpl]).astype(wdt),         # (NB, C, H)
        end_b=jnp.stack([p["end_b"] for p in cpl]).astype(jnp.float32),
        ld_const=ld_const,                                     # host scalar (f32)
    )


def _pad_time(x, x_mask, min_extra=0, multiple=128):
    """Pad the time axis to a lane-aligned length >= T + min_extra (roll halo)."""
    T = x.shape[-1]
    T_pad = ((T + min_extra + multiple - 1) // multiple) * multiple
    T_pad = max(T_pad, multiple)
    if T_pad != T:
        pad = T_pad - T
        x = jnp.pad(x, ((0, 0), (0, 0), (0, pad)))
        x_mask = jnp.pad(x_mask, ((0, 0), (0, 0), (0, pad)))
    return x, x_mask


def flow_spec_decoder_forward(params, x, x_mask, cfg, compute_dtype=jnp.bfloat16):
    n_sqz = cfg["n_sqz"]
    if n_sqz > 1:
        x, x_mask = squeeze(x, x_mask, n_sqz)
    T_valid = x.shape[-1]
    x_len = jnp.sum(x_mask, axis=(1, 2))                       # host-side, once
    max_pad = ((cfg["kernel_size"] - 1)
               * (cfg["dilation_rate"] ** (cfg["n_layers"] - 1))) // 2
    x_p, m_p = _pad_time(x, x_mask, min_extra=max_pad)
    packed = pack_params(params, cfg, compute_dtype)
    z, ld = fused_flow_forward(x_p, m_p, packed, cfg, compute_dtype)
    logdet = ld + packed["ld_const"] * x_len                   # data-independent part
    z = z[:, :, :T_valid]
    if n_sqz > 1:
        z, x_mask = unsqueeze(z, x_mask, n_sqz)
    return z, logdet


# ---------------------------------------------------------------------------
# Deterministic parameter init (synthetic; shapes follow the PyTorch module)
# ---------------------------------------------------------------------------
def init_params(key, cfg):
    C = cfg["in_channels"] * cfg["n_sqz"]
    H = cfg["hidden_channels"]
    K = cfg["kernel_size"]
    L = cfg["n_layers"]
    n_half = C // 2
    blocks = []
    for _ in range(cfg["n_blocks"]):
        key, *ks = jax.random.split(key, 12)
        logs = 0.1 * jax.random.normal(ks[0], (C, 1), jnp.float32)
        bias = 0.1 * jax.random.normal(ks[1], (C, 1), jnp.float32)
        # InvConvNear: orthogonal init, flip a column if det < 0 (as in the module)
        w = jax.random.normal(ks[2], (cfg["n_split"], cfg["n_split"]), jnp.float32)
        w, _ = jnp.linalg.qr(w)
        det = jnp.linalg.det(w)
        w = w.at[:, 0].set(jnp.where(det < 0, -w[:, 0], w[:, 0]))
        start_w = 0.3 * jax.random.normal(ks[3], (H, n_half), jnp.float32)
        start_b = 0.1 * jax.random.normal(ks[4], (H, 1), jnp.float32)
        in_w = 0.2 * jax.random.normal(ks[5], (L, K, 2 * H, H), jnp.float32)
        in_b = 0.1 * jax.random.normal(ks[6], (L, 2 * H, 1), jnp.float32)
        rs_w = 0.2 * jax.random.normal(ks[7], (L, 2 * H, H), jnp.float32)
        rs_b = 0.1 * jax.random.normal(ks[8], (L, 2 * H, 1), jnp.float32)
        # last WN layer has only `hidden` res/skip channels -> zero the unused half
        rs_w = rs_w.at[L - 1, H:].set(0.0)
        rs_b = rs_b.at[L - 1, H:].set(0.0)
        # NOTE: the PyTorch module zero-inits `end`; small random values are used
        # here so the coupling math is numerically exercised.
        end_w = 0.05 * jax.random.normal(ks[9], (C, H), jnp.float32)
        end_b = 0.05 * jax.random.normal(ks[10], (C, 1), jnp.float32)
        blocks.append(dict(
            actnorm_logs=logs, actnorm_bias=bias, invconv_w=w,
            coupling=dict(start_w=start_w, start_b=start_b, in_w=in_w, in_b=in_b,
                          rs_w=rs_w, rs_b=rs_b, end_w=end_w, end_b=end_b)))
    return dict(blocks=blocks)


# ---------------------------------------------------------------------------
# Pure-JAX reference (mirrors the PyTorch forward) used for verification
# ---------------------------------------------------------------------------
def _conv1d_ref(x, w, b, dilation=1):
    B, Ci, T = x.shape
    Co, _, Kk = w.shape
    pad = (Kk * dilation - dilation) // 2
    xp = jnp.pad(x, ((0, 0), (0, 0), (pad, pad)))
    y = jnp.zeros((B, Co, T), x.dtype)
    for k in range(Kk):
        y = y + jnp.einsum("oc,bct->bot", w[:, :, k],
                           xp[:, :, k * dilation:k * dilation + T])
    return y + b[None, :, None]


def _actnorm_ref(x, mask, logs, bias):
    z = (bias[None] + jnp.exp(logs)[None] * x) * mask
    x_len = jnp.sum(mask, axis=(1, 2))
    return z, jnp.sum(logs) * x_len


def _invconv_ref(x, mask, W, n_split):
    B, C, T = x.shape
    x_len = jnp.sum(mask, axis=(1, 2))
    xr = x.reshape(B, 2, C // n_split, n_split // 2, T)
    xr = jnp.transpose(xr, (0, 1, 3, 2, 4)).reshape(B, n_split, C // n_split, T)
    z = jnp.einsum("ij,bjqt->biqt", W, xr)
    z = z.reshape(B, 2, n_split // 2, C // n_split, T)
    z = jnp.transpose(z, (0, 1, 3, 2, 4)).reshape(B, C, T) * mask
    _, logabs = jnp.linalg.slogdet(W)
    return z, logabs * (C / n_split) * x_len


def _coupling_ref(x, mask, p, cfg):
    C = x.shape[1]
    n_half = C // 2
    H = cfg["hidden_channels"]
    x0, x1 = x[:, :n_half], x[:, n_half:]
    h = (jnp.einsum("oc,bct->bot", p["start_w"], x0) + p["start_b"][None]) * mask
    out = jnp.zeros_like(h)
    for i in range(cfg["n_layers"]):
        d = cfg["dilation_rate"] ** i
        w = jnp.transpose(p["in_w"][i], (1, 2, 0))          # [2H, H, K]
        x_in = _conv1d_ref(h, w, p["in_b"][i, :, 0], d)
        acts = jnp.tanh(x_in[:, :H]) * jax.nn.sigmoid(x_in[:, H:])
        rs = jnp.einsum("oc,bct->bot", p["rs_w"][i], acts) + p["rs_b"][i][None]
        if i < cfg["n_layers"] - 1:
            h = (h + rs[:, :H]) * mask
            out = out + rs[:, H:]
        else:
            out = out + rs[:, :H]
    out = out * mask
    o = jnp.einsum("oc,bct->bot", p["end_w"], out) + p["end_b"][None]
    m, logs = o[:, :n_half], o[:, n_half:]
    if cfg["sigmoid_scale"]:
        logs = jnp.log(1e-6 + jax.nn.sigmoid(logs + 2.0))
    z1 = (m + jnp.exp(logs) * x1) * mask
    z = jnp.concatenate([x0, z1], axis=1)
    return z, jnp.sum(logs * mask, axis=(1, 2))


def flow_spec_decoder_ref(params, x, x_mask, cfg):
    n_sqz = cfg["n_sqz"]
    if n_sqz > 1:
        x, x_mask = squeeze(x, x_mask, n_sqz)
    logdet_tot = jnp.zeros((x.shape[0],), jnp.float32)
    for blk in params["blocks"]:
        x, ld = _actnorm_ref(x, x_mask, blk["actnorm_logs"], blk["actnorm_bias"])
        logdet_tot = logdet_tot + ld
        x, ld = _invconv_ref(x, x_mask, blk["invconv_w"], cfg["n_split"])
        logdet_tot = logdet_tot + ld
        x, ld = _coupling_ref(x, x_mask, blk["coupling"], cfg)
        logdet_tot = logdet_tot + ld
    if n_sqz > 1:
        x, x_mask = unsqueeze(x, x_mask, n_sqz)
    return x, logdet_tot


# ---------------------------------------------------------------------------
if __name__ == "__main__":
    cfg = dict(in_channels=8, hidden_channels=32, kernel_size=3, dilation_rate=1,
               n_blocks=2, n_layers=4, p_dropout=0.0, n_split=4, n_sqz=2,
               sigmoid_scale=False, gin_channels=0)

    key = jax.random.PRNGKey(0)
    kp, kx = jax.random.split(key)
    params = init_params(kp, cfg)

    B, T = 2, 16
    x = jax.random.normal(kx, (B, cfg["in_channels"], T), jnp.float32)
    lengths = jnp.array([16, 12], jnp.int32)
    x_mask = (jnp.arange(T)[None, None, :] < lengths[:, None, None]).astype(jnp.float32)

    z_ref, logdet_ref = flow_spec_decoder_ref(params, x, x_mask, cfg)

    # f32 path: faithful to the PyTorch module -> tight check
    z, logdet = flow_spec_decoder_forward(params, x, x_mask, cfg, jnp.float32)
    z = jax.block_until_ready(z)
    logdet = jax.block_until_ready(logdet)
    assert z.shape == (B, cfg["in_channels"], T) and logdet.shape == (B,)
    assert jnp.allclose(z, z_ref, atol=2e-3, rtol=2e-3), float(jnp.max(jnp.abs(z - z_ref)))
    assert jnp.allclose(logdet, logdet_ref, atol=2e-3, rtol=2e-3), (logdet, logdet_ref)

    # bf16 MXU-operand path (v6e/v7x fast path, default) -> looser numerical check
    z16, logdet16 = flow_spec_decoder_forward(params, x, x_mask, cfg, jnp.bfloat16)
    z16 = jax.block_until_ready(z16)
    logdet16 = jax.block_until_ready(logdet16)
    assert jnp.allclose(z16, z_ref, atol=1e-1, rtol=1e-1), float(jnp.max(jnp.abs(z16 - z_ref)))
    assert jnp.allclose(logdet16, logdet_ref, atol=5e-1, rtol=5e-2), (logdet16, logdet_ref)

    print("KERNEL_OK")
</pallas_src>

<mosaic_0001>
module attributes {stable_mosaic.version = 11 : i64} {
  func.func @_flow_block_kernel(%arg0: i32, %arg1: i32, %arg2: memref<1x16x128xf32, #tpu.memory_space<vmem>>, %arg3: memref<1x1x128xf32, #tpu.memory_space<vmem>>, %arg4: memref<1x48x16xf32, #tpu.memory_space<vmem>>, %arg5: memref<1x48x1xf32, #tpu.memory_space<vmem>>, %arg6: memref<1x12x64x32xf32, #tpu.memory_space<vmem>>, %arg7: memref<1x4x64x1xf32, #tpu.memory_space<vmem>>, %arg8: memref<1x4x64x32xf32, #tpu.memory_space<vmem>>, %arg9: memref<1x4x64x1xf32, #tpu.memory_space<vmem>>, %arg10: memref<1x16x32xf32, #tpu.memory_space<vmem>>, %arg11: memref<1x16x1xf32, #tpu.memory_space<vmem>>, %arg12: memref<1x16x128xf32, #tpu.memory_space<vmem>>, %arg13: memref<1x1x1xf32, #tpu.memory_space<vmem>>, %arg14: memref<16x128xf32, #tpu.memory_space<vmem>>, %arg15: memref<1x1xf32, #tpu.memory_space<vmem>>) attributes {dimension_semantics = [#tpu.dimension_semantics<parallel>, #tpu.dimension_semantics<arbitrary>], iteration_bounds = array<i64: 2, 2>, scalar_prefetch = 0 : i64, scratch_operands = 2 : i64, tpu.core_type = #tpu.core_type<tc>, window_params = [{transform_indices = @transform_0, window_bounds = array<i64: 1, 16, 128>}, {transform_indices = @transform_1, window_bounds = array<i64: 1, 1, 128>}, {transform_indices = @transform_2, window_bounds = array<i64: 1, 48, 16>}, {transform_indices = @transform_3, window_bounds = array<i64: 1, 48, 1>}, {transform_indices = @transform_4, window_bounds = array<i64: 1, 12, 64, 32>}, {transform_indices = @transform_5, window_bounds = array<i64: 1, 4, 64, 1>}, {transform_indices = @transform_6, window_bounds = array<i64: 1, 4, 64, 32>}, {transform_indices = @transform_7, window_bounds = array<i64: 1, 4, 64, 1>}, {transform_indices = @transform_8, window_bounds = array<i64: 1, 16, 32>}, {transform_indices = @transform_9, window_bounds = array<i64: 1, 16, 1>}, {transform_indices = @transform_10, window_bounds = array<i64: 1, 16, 128>}, {transform_indices = @transform_11, window_bounds = array<i64: 1, 1, 1>}]} {
    %c0 = arith.constant 0 : index
    %c0_0 = arith.constant 0 : index
    %c0_1 = arith.constant 0 : index
    %0 = vector.load %arg3[%c0, %c0_0, %c0_1] : memref<1x1x128xf32, #tpu.memory_space<vmem>>, vector<1x1x128xf32>
    %1 = vector.shape_cast %0 : vector<1x1x128xf32> to vector<1x128xf32>
    %c0_i32 = arith.constant 0 : i32
    %2 = arith.cmpi eq, %arg1, %c0_i32 : i32
    %3 = arith.extui %2 : i1 to i32
    %c0_i32_2 = arith.constant 0 : i32
    %4 = arith.cmpi ne, %3, %c0_i32_2 : i32
    scf.if %4 {
      %c0_58 = arith.constant 0 : index
      %c0_59 = arith.constant 0 : index
      %c0_60 = arith.constant 0 : index
      %90 = vector.load %arg2[%c0_58, %c0_59, %c0_60] : memref<1x16x128xf32, #tpu.memory_space<vmem>>, vector<1x16x128xf32>
      %91 = vector.shape_cast %90 : vector<1x16x128xf32> to vector<16x128xf32>
      %c0_61 = arith.constant 0 : index
      %c0_62 = arith.constant 0 : index
      %92 = vector.load %arg14[%c0_61, %c0_62] : memref<16x128xf32, #tpu.memory_space<vmem>>, vector<16x128xf32>
      tpu.vector_store %arg14[%c0_61, %c0_62], %91 {strides = array<i32>} : memref<16x128xf32, #tpu.memory_space<vmem>>, vector<16x128xf32>,
      %cst_63 = arith.constant 0.000000e+00 : f32
      %93 = vector.broadcast %cst_63 : f32 to vector<1x1xf32>
      %c0_64 = arith.constant 0 : index
      %c0_65 = arith.constant 0 : index
      %94 = vector.load %arg15[%c0_64, %c0_65] : memref<1x1xf32, #tpu.memory_space<vmem>>, vector<1x1xf32>
      tpu.vector_store %arg15[%c0_64, %c0_65], %93 {strides = array<i32>} : memref<1x1xf32, #tpu.memory_space<vmem>>, vector<1x1xf32>,
    } else {
    }
    %c0_3 = arith.constant 0 : index
    %c0_4 = arith.constant 0 : index
    %5 = vector.load %arg14[%c0_3, %c0_4] : memref<16x128xf32, #tpu.memory_space<vmem>>, vector<16x128xf32>
    %c0_5 = arith.constant 0 : index
    %c0_6 = arith.constant 0 : index
    %c0_7 = arith.constant 0 : index
    %6 = vector.load %arg4[%c0_5, %c0_6, %c0_7] : memref<1x48x16xf32, #tpu.memory_space<vmem>>, vector<1x48x16xf32>
    %7 = vector.shape_cast %6 : vector<1x48x16xf32> to vector<48x16xf32>
    %cst = arith.constant dense<0.000000e+00> : vector<48x128xf32>
    %8 = tpu.matmul %7, %5, %cst {dimension_numbers = #tpu.dot_dimension_numbers<[1], [0], [0], [1], [0, 0, 1, 1], [], []>} : vector<48x16xf32>, vector<16x128xf32>, vector<48x128xf32> -> vector<48x128xf32>
    %c0_8 = arith.constant 0 : index
    %c0_9 = arith.constant 0 : index
    %c0_10 = arith.constant 0 : index
    %9 = vector.load %arg5[%c0_8, %c0_9, %c0_10] : memref<1x48x1xf32, #tpu.memory_space<vmem>>, vector<1x48x1xf32>
    %10 = vector.shape_cast %9 : vector<1x48x1xf32> to vector<48x1xf32>
    %11 = vector.broadcast %10 : vector<48x1xf32> to vector<48x128xf32>
    %12 = arith.addf %8, %11 : vector<48x128xf32>
    %13 = vector.broadcast %1 : vector<1x128xf32> to vector<48x128xf32>
    %14 = arith.mulf %12, %13 : vector<48x128xf32>
    %15 = vector.extract_strided_slice %14 {offsets = [0, 0], sizes = [8, 128], strides = [1, 1]} : vector<48x128xf32> to vector<8x128xf32>
    %16 = vector.extract_strided_slice %14 {offsets = [8, 0], sizes = [8, 128], strides = [1, 1]} : vector<48x128xf32> to vector<8x128xf32>
    %17 = vector.extract_strided_slice %14 {offsets = [16, 0], sizes = [32, 128], strides = [1, 1]} : vector<48x128xf32> to vector<32x128xf32>
    %cst_11 = arith.constant 0.000000e+00 : f32
    %18 = vector.broadcast %cst_11 : f32 to vector<32x128xf32>
    %c0_i32_12 = arith.constant 0 : i32
    %c3_i32 = arith.constant 3 : i32
    %19 = arith.addi %c0_i32_12, %c3_i32 : i32
    %c1_i32 = arith.constant 1 : i32
    %20:2 = scf.for %arg16 = %c0_i32_12 to %19 step %c1_i32 iter_args(%arg17 = %17, %arg18 = %18) -> (vector<32x128xf32>, vector<32x128xf32>)  : i32 {
      %cst_58 = arith.constant 0.000000e+00 : f32
      %90 = vector.broadcast %cst_58 : f32 to vector<64x128xf32>
      %c1_i32_59 = arith.constant 1 : i32
      %91 = tpu.dynamic_rotate %arg17 by %c1_i32_59 dim 1 : vector<32x128xf32>, i32 -> vector<32x128xf32>
      %c3_i32_60 = arith.constant 3 : i32
      %92 = arith.muli %arg16, %c3_i32_60 : i32
      %c0_i32_61 = arith.constant 0 : i32
      %93 = arith.addi %92, %c0_i32_61 : i32
      %c0_62 = arith.constant 0 : index
      %94 = arith.index_cast %93 : i32 to index
      %c0_63 = arith.constant 0 : index
      %c0_64 = arith.constant 0 : index
      %95 = vector.load %arg6[%c0_62, %94, %c0_63, %c0_64] : memref<1x12x64x32xf32, #tpu.memory_space<vmem>>, vector<1x1x64x32xf32>
      %96 = vector.shape_cast %95 : vector<1x1x64x32xf32> to vector<64x32xf32>
      %cst_65 = arith.constant dense<0.000000e+00> : vector<64x128xf32>
      %97 = tpu.matmul %96, %91, %cst_65 {dimension_numbers = #tpu.dot_dimension_numbers<[1], [0], [0], [1], [0, 0, 1, 1], [], []>} : vector<64x32xf32>, vector<32x128xf32>, vector<64x128xf32> -> vector<64x128xf32>
      %98 = arith.addf %90, %97 : vector<64x128xf32>
      %c3_i32_66 = arith.constant 3 : i32
      %99 = arith.muli %arg16, %c3_i32_66 : i32
      %c1_i32_67 = arith.constant 1 : i32
      %100 = arith.addi %99, %c1_i32_67 : i32
      %c0_68 = arith.constant 0 : index
      %101 = arith.index_cast %100 : i32 to index
      %c0_69 = arith.constant 0 : index
      %c0_70 = arith.constant 0 : index
      %102 = vector.load %arg6[%c0_68, %101, %c0_69, %c0_70] : memref<1x12x64x32xf32, #tpu.memory_space<vmem>>, vector<1x1x64x32xf32>
      %103 = vector.shape_cast %102 : vector<1x1x64x32xf32> to vector<64x32xf32>
      %cst_71 = arith.constant dense<0.000000e+00> : vector<64x128xf32>
      %104 = tpu.matmul %103, %arg17, %cst_71 {dimension_numbers = #tpu.dot_dimension_numbers<[1], [0], [0], [1], [0, 0, 1, 1], [], []>} : vector<64x32xf32>, vector<32x128xf32>, vector<64x128xf32> -> vector<64x128xf32>
      %105 = arith.addf %98, %104 : vector<64x128xf32>
      %c127_i32_72 = arith.constant 127 : i32
      %106 = tpu.dynamic_rotate %arg17 by %c127_i32_72 dim 1 : vector<32x128xf32>, i32 -> vector<32x128xf32>
      %c3_i32_73 = arith.constant 3 : i32
      %107 = arith.muli %arg16, %c3_i32_73 : i32
      %c2_i32 = arith.constant 2 : i32
      %108 = arith.addi %107, %c2_i32 : i32
      %c0_74 = arith.constant 0 : index
      %109 = arith.index_cast %108 : i32 to index
      %c0_75 = arith.constant 0 : index
      %c0_76 = arith.constant 0 : index
      %110 = vector.load %arg6[%c0_74, %109, %c0_75, %c0_76] : memref<1x12x64x32xf32, #tpu.memory_space<vmem>>, vector<1x1x64x32xf32>
      %111 = vector.shape_cast %110 : vector<1x1x64x32xf32> to vector<64x32xf32>
      %cst_77 = arith.constant dense<0.000000e+00> : vector<64x128xf32>
      %112 = tpu.matmul %111, %106, %cst_77 {dimension_numbers = #tpu.dot_dimension_numbers<[1], [0], [0], [1], [0, 0, 1, 1], [], []>} : vector<64x32xf32>, vector<32x128xf32>, vector<64x128xf32> -> vector<64x128xf32>
      %113 = arith.addf %105, %112 : vector<64x128xf32>
      %c0_78 = arith.constant 0 : index
      %114 = arith.index_cast %arg16 : i32 to index
      %c0_79 = arith.constant 0 : index
      %c0_80 = arith.constant 0 : index
      %115 = vector.load %arg7[%c0_78, %114, %c0_79, %c0_80] : memref<1x4x64x1xf32, #tpu.memory_space<vmem>>, vector<1x1x64x1xf32>
      %116 = vector.shape_cast %115 : vector<1x1x64x1xf32> to vector<64x1xf32>
      %117 = vector.broadcast %116 : vector<64x1xf32> to vector<64x128xf32>
      %118 = arith.addf %113, %117 : vector<64x128xf32>
      %119 = vector.extract_strided_slice %118 {offsets = [0, 0], sizes = [32, 128], strides = [1, 1]} : vector<64x128xf32> to vector<32x128xf32>
      %120 = math.tanh %119 : vector<32x128xf32>
      %121 = vector.extract_strided_slice %118 {offsets = [32, 0], sizes = [32, 128], strides = [1, 1]} : vector<64x128xf32> to vector<32x128xf32>
      %122 = arith.negf %121 : vector<32x128xf32>
      %123 = math.exp %122 : vector<32x128xf32>
      %cst_81 = arith.constant 1.000000e+00 : f32
      %124 = vector.broadcast %cst_81 : f32 to vector<32x128xf32>
      %125 = arith.addf %124, %123 : vector<32x128xf32>
      %126 = arith.divf %124, %125 : vector<32x128xf32>
      %127 = arith.mulf %120, %126 : vector<32x128xf32>
      %c0_82 = arith.constant 0 : index
      %128 = arith.index_cast %arg16 : i32 to index
      %c0_83 = arith.constant 0 : index
      %c0_84 = arith.constant 0 : index
      %129 = vector.load %arg8[%c0_82, %128, %c0_83, %c0_84] : memref<1x4x64x32xf32, #tpu.memory_space<vmem>>, vector<1x1x64x32xf32>
      %130 = vector.shape_cast %129 : vector<1x1x64x32xf32> to vector<64x32xf32>
      %cst_85 = arith.constant dense<0.000000e+00> : vector<64x128xf32>
      %131 = tpu.matmul %130, %127, %cst_85 {dimension_numbers = #tpu.dot_dimension_numbers<[1], [0], [0], [1], [0, 0, 1, 1], [], []>} : vector<64x32xf32>, vector<32x128xf32>, vector<64x128xf32> -> vector<64x128xf32>
      %c0_86 = arith.constant 0 : index
      %132 = arith.index_cast %arg16 : i32 to index
      %c0_87 = arith.constant 0 : index
      %c0_88 = arith.constant 0 : index
      %133 = vector.load %arg9[%c0_86, %132, %c0_87, %c0_88] : memref<1x4x64x1xf32, #tpu.memory_space<vmem>>, vector<1x1x64x1xf32>
      %134 = vector.shape_cast %133 : vector<1x1x64x1xf32> to vector<64x1xf32>
      %135 = vector.broadcast %134 : vector<64x1xf32> to vector<64x128xf32>
      %136 = arith.addf %131, %135 : vector<64x128xf32>
      %137 = vector.extract_strided_slice %136 {offsets = [0, 0], sizes = [32, 128], strides = [1, 1]} : vector<64x128xf32> to vector<32x128xf32>
      %138 = arith.addf %arg17, %137 : vector<32x128xf32>
      %139 = vector.broadcast %1 : vector<1x128xf32> to vector<32x128xf32>
      %140 = arith.mulf %138, %139 : vector<32x128xf32>
      %141 = vector.extract_strided_slice %136 {offsets = [32, 0], sizes = [32, 128], strides = [1, 1]} : vector<64x128xf32> to vector<32x128xf32>
      %142 = arith.addf %arg18, %141 : vector<32x128xf32>
      scf.yield %140, %142 : vector<32x128xf32>, vector<32x128xf32>
    }
    %c3_i32_13 = arith.constant 3 : i32
    %cst_14 = arith.constant 0.000000e+00 : f32
    %21 = vector.broadcast %cst_14 : f32 to vector<64x128xf32>
    %c1_i32_15 = arith.constant 1 : i32
    %22 = tpu.dynamic_rotate %20#0 by %c1_i32_15 dim 1 : vector<32x128xf32>, i32 -> vector<32x128xf32>
    %c0_16 = arith.constant 0 : index
    %c9 = arith.constant 9 : index
    %c0_17 = arith.constant 0 : index
    %c0_18 = arith.constant 0 : index
    %23 = vector.load %arg6[%c0_16, %c9, %c0_17, %c0_18] : memref<1x12x64x32xf32, #tpu.memory_space<vmem>>, vector<1x1x64x32xf32>
    %24 = vector.shape_cast %23 : vector<1x1x64x32xf32> to vector<64x32xf32>
    %cst_19 = arith.constant dense<0.000000e+00> : vector<64x128xf32>
    %25 = tpu.matmul %24, %22, %cst_19 {dimension_numbers = #tpu.dot_dimension_numbers<[1], [0], [0], [1], [0, 0, 1, 1], [], []>} : vector<64x32xf32>, vector<32x128xf32>, vector<64x128xf32> -> vector<64x128xf32>
    %26 = arith.addf %21, %25 : vector<64x128xf32>
    %c0_20 = arith.constant 0 : index
    %c10 = arith.constant 10 : index
    %c0_21 = arith.constant 0 : index
    %c0_22 = arith.constant 0 : index
    %27 = vector.load %arg6[%c0_20, %c10, %c0_21, %c0_22] : memref<1x12x64x32xf32, #tpu.memory_space<vmem>>, vector<1x1x64x32xf32>
    %28 = vector.shape_cast %27 : vector<1x1x64x32xf32> to vector<64x32xf32>
    %cst_23 = arith.constant dense<0.000000e+00> : vector<64x128xf32>
    %29 = tpu.matmul %28, %20#0, %cst_23 {dimension_numbers = #tpu.dot_dimension_numbers<[1], [0], [0], [1], [0, 0, 1, 1], [], []>} : vector<64x32xf32>, vector<32x128xf32>, vector<64x128xf32> -> vector<64x128xf32>
    %30 = arith.addf %26, %29 : vector<64x128xf32>
    %c127_i32 = arith.constant 127 : i32
    %31 = tpu.dynamic_rotate %20#0 by %c127_i32 dim 1 : vector<32x128xf32>, i32 -> vector<32x128xf32>
    %c0_24 = arith.constant 0 : index
    %c11 = arith.constant 11 : index
    %c0_25 = arith.constant 0 : index
    %c0_26 = arith.constant 0 : index
    %32 = vector.load %arg6[%c0_24, %c11, %c0_25, %c0_26] : memref<1x12x64x32xf32, #tpu.memory_space<vmem>>, vector<1x1x64x32xf32>
    %33 = vector.shape_cast %32 : vector<1x1x64x32xf32> to vector<64x32xf32>
    %cst_27 = arith.constant dense<0.000000e+00> : vector<64x128xf32>
    %34 = tpu.matmul %33, %31, %cst_27 {dimension_numbers = #tpu.dot_dimension_numbers<[1], [0], [0], [1], [0, 0, 1, 1], [], []>} : vector<64x32xf32>, vector<32x128xf32>, vector<64x128xf32> -> vector<64x128xf32>
    %35 = arith.addf %30, %34 : vector<64x128xf32>
    %c0_28 = arith.constant 0 : index
    %c3 = arith.constant 3 : index
    %c0_29 = arith.constant 0 : index
    %c0_30 = arith.constant 0 : index
    %36 = vector.load %arg7[%c0_28, %c3, %c0_29, %c0_30] : memref<1x4x64x1xf32, #tpu.memory_space<vmem>>, vector<1x1x64x1xf32>
    %37 = vector.shape_cast %36 : vector<1x1x64x1xf32> to vector<64x1xf32>
    %38 = vector.broadcast %37 : vector<64x1xf32> to vector<64x128xf32>
    %39 = arith.addf %35, %38 : vector<64x128xf32>
    %40 = vector.extract_strided_slice %39 {offsets = [0, 0], sizes = [32, 128], strides = [1, 1]} : vector<64x128xf32> to vector<32x128xf32>
    %41 = math.tanh %40 : vector<32x128xf32>
    %42 = vector.extract_strided_slice %39 {offsets = [32, 0], sizes = [32, 128], strides = [1, 1]} : vector<64x128xf32> to vector<32x128xf32>
    %43 = arith.negf %42 : vector<32x128xf32>
    %44 = math.exp %43 : vector<32x128xf32>
    %cst_31 = arith.constant 1.000000e+00 : f32
    %45 = vector.broadcast %cst_31 : f32 to vector<32x128xf32>
    %46 = arith.addf %45, %44 : vector<32x128xf32>
    %47 = arith.divf %45, %46 : vector<32x128xf32>
    %48 = arith.mulf %41, %47 : vector<32x128xf32>
    %c0_32 = arith.constant 0 : index
    %c3_33 = arith.constant 3 : index
    %c0_34 = arith.constant 0 : index
    %c0_35 = arith.constant 0 : index
    %49 = vector.load %arg8[%c0_32, %c3_33, %c0_34, %c0_35] : memref<1x4x64x32xf32, #tpu.memory_space<vmem>>, vector<1x1x64x32xf32>
    %50 = vector.shape_cast %49 : vector<1x1x64x32xf32> to vector<64x32xf32>
    %51 = vector.extract_strided_slice %50 {offsets = [0, 0], sizes = [32, 32], strides = [1, 1]} : vector<64x32xf32> to vector<32x32xf32>
    %cst_36 = arith.constant dense<0.000000e+00> : vector<32x128xf32>
    %52 = tpu.matmul %51, %48, %cst_36 {dimension_numbers = #tpu.dot_dimension_numbers<[1], [0], [0], [1], [0, 0, 1, 1], [], []>} : vector<32x32xf32>, vector<32x128xf32>, vector<32x128xf32> -> vector<32x128xf32>
    %c0_37 = arith.constant 0 : index
    %c3_38 = arith.constant 3 : index
    %c0_39 = arith.constant 0 : index
    %c0_40 = arith.constant 0 : index
    %53 = vector.load %arg9[%c0_37, %c3_38, %c0_39, %c0_40] : memref<1x4x64x1xf32, #tpu.memory_space<vmem>>, vector<1x1x64x1xf32>
    %54 = vector.shape_cast %53 : vector<1x1x64x1xf32> to vector<64x1xf32>
    %55 = vector.extract_strided_slice %54 {offsets = [0, 0], sizes = [32, 1], strides = [1, 1]} : vector<64x1xf32> to vector<32x1xf32>
    %56 = vector.broadcast %55 : vector<32x1xf32> to vector<32x128xf32>
    %57 = arith.addf %52, %56 : vector<32x128xf32>
    %58 = arith.addf %20#1, %57 : vector<32x128xf32>
    %59 = vector.broadcast %1 : vector<1x128xf32> to vector<32x128xf32>
    %60 = arith.mulf %58, %59 : vector<32x128xf32>
    %c0_41 = arith.constant 0 : index
    %c0_42 = arith.constant 0 : index
    %c0_43 = arith.constant 0 : index
    %61 = vector.load %arg10[%c0_41, %c0_42, %c0_43] : memref<1x16x32xf32, #tpu.memory_space<vmem>>, vector<1x16x32xf32>
    %62 = vector.shape_cast %61 : vector<1x16x32xf32> to vector<16x32xf32>
    %cst_44 = arith.constant dense<0.000000e+00> : vector<16x128xf32>
    %63 = tpu.matmul %62, %60, %cst_44 {dimension_numbers = #tpu.dot_dimension_numbers<[1], [0], [0], [1], [0, 0, 1, 1], [], []>} : vector<16x32xf32>, vector<32x128xf32>, vector<16x128xf32> -> vector<16x128xf32>
    %c0_45 = arith.constant 0 : index
    %c0_46 = arith.constant 0 : index
    %c0_47 = arith.constant 0 : index
    %64 = vector.load %arg11[%c0_45, %c0_46, %c0_47] : memref<1x16x1xf32, #tpu.memory_space<vmem>>, vector<1x16x1xf32>
    %65 = vector.shape_cast %64 : vector<1x16x1xf32> to vector<16x1xf32>
    %66 = vector.broadcast %65 : vector<16x1xf32> to vector<16x128xf32>
    %67 = arith.addf %63, %66 : vector<16x128xf32>
    %68 = vector.extract_strided_slice %67 {offsets = [0, 0], sizes = [8, 128], strides = [1, 1]} : vector<16x128xf32> to vector<8x128xf32>
    %69 = vector.extract_strided_slice %67 {offsets = [8, 0], sizes = [8, 128], strides = [1, 1]} : vector<16x128xf32> to vector<8x128xf32>
    %70 = math.exp %69 : vector<8x128xf32>
    %71 = arith.mulf %70, %16 : vector<8x128xf32>
    %72 = arith.addf %68, %71 : vector<8x128xf32>
    %73 = vector.broadcast %1 : vector<1x128xf32> to vector<8x128xf32>
    %74 = arith.mulf %72, %73 : vector<8x128xf32>
    %c0_48 = arith.constant 0 : index
    %c0_49 = arith.constant 0 : index
    %75 = vector.load %arg15[%c0_48, %c0_49] : memref<1x1xf32, #tpu.memory_space<vmem>>, vector<1x1xf32>
    %76 = vector.broadcast %1 : vector<1x128xf32> to vector<8x128xf32>
    %77 = arith.mulf %69, %76 : vector<8x128xf32>
    %cst_50 = arith.constant dense<0.000000e+00> : vector<8xf32>
    %78 = vector.multi_reduction <add>, %77, %cst_50 [1] : vector<8x128xf32> to vector<8xf32>
    %79 = vector.shape_cast %78 : vector<8xf32> to vector<8x1xf32>
    %cst_51 = arith.constant dense<0.000000e+00> : vector<1xf32>
    %80 = vector.multi_reduction <add>, %79, %cst_51 [0] : vector<8x1xf32> to vector<1xf32>
    %81 = vector.shape_cast %80 : vector<1xf32> to vector<1x1xf32>
    %82 = arith.addf %75, %81 : vector<1x1xf32>
    %c0_52 = arith.constant 0 : index
    %c0_53 = arith.constant 0 : index
    %83 = vector.load %arg15[%c0_52, %c0_53] : memref<1x1xf32, #tpu.memory_space<vmem>>, vector<1x1xf32>
    tpu.vector_store %arg15[%c0_52, %c0_53], %82 {strides = array<i32>} : memref<1x1xf32, #tpu.memory_space<vmem>>, vector<1x1xf32>,
    %c1_i32_54 = arith.constant 1 : i32
    %84 = arith.cmpi slt, %arg1, %c1_i32_54 : i32
    %85 = arith.extui %84 : i1 to i32
    %c0_i32_55 = arith.constant 0 : i32
    %86 = arith.cmpi ne, %85, %c0_i32_55 : i32
    scf.if %86 {
      %c0_58 = arith.constant 0 : index
      %c0_59 = arith.constant 0 : index
      %90 = vector.load %arg14[%c0_58, %c0_59] : memref<16x128xf32, #tpu.memory_space<vmem>>, vector<8x128xf32>
      tpu.vector_store %arg14[%c0_58, %c0_59], %15 {strides = array<i32>} : memref<16x128xf32, #tpu.memory_space<vmem>>, vector<8x128xf32>,
      %c8 = arith.constant 8 : index
      %c0_60 = arith.constant 0 : index
      %91 = vector.load %arg14[%c8, %c0_60] : memref<16x128xf32, #tpu.memory_space<vmem>>, vector<8x128xf32>
      tpu.vector_store %arg14[%c8, %c0_60], %74 {strides = array<i32>} : memref<16x128xf32, #tpu.memory_space<vmem>>, vector<8x128xf32>,
    } else {
    }
    %c1_i32_56 = arith.constant 1 : i32
    %87 = arith.cmpi eq, %arg1, %c1_i32_56 : i32
    %88 = arith.extui %87 : i1 to i32
    %c0_i32_57 = arith.constant 0 : i32
    %89 = arith.cmpi ne, %88, %c0_i32_57 : i32
    scf.if %89 {
      %c0_58 = arith.constant 0 : index
      %c0_59 = arith.constant 0 : index
      %c0_60 = arith.constant 0 : index
      %90 = vector.load %arg12[%c0_58, %c0_59, %c0_60] : memref<1x16x128xf32, #tpu.memory_space<vmem>>, vector<1x8x128xf32>
      %91 = vector.shape_cast %90 : vector<1x8x128xf32> to vector<8x128xf32>
      %92 = vector.shape_cast %15 : vector<8x128xf32> to vector<1x8x128xf32>
      tpu.vector_store %arg12[%c0_58, %c0_59, %c0_60], %92 {strides = array<i32>} : memref<1x16x128xf32, #tpu.memory_space<vmem>>, vector<1x8x128xf32>,
      %c0_61 = arith.constant 0 : index
      %c8 = arith.constant 8 : index
      %c0_62 = arith.constant 0 : index
      %93 = vector.load %arg12[%c0_61, %c8, %c0_62] : memref<1x16x128xf32, #tpu.memory_space<vmem>>, vector<1x8x128xf32>
      %94 = vector.shape_cast %93 : vector<1x8x128xf32> to vector<8x128xf32>
      %95 = vector.shape_cast %74 : vector<8x128xf32> to vector<1x8x128xf32>
      tpu.vector_store %arg12[%c0_61, %c8, %c0_62], %95 {strides = array<i32>} : memref<1x16x128xf32, #tpu.memory_space<vmem>>, vector<1x8x128xf32>,
      %c0_63 = arith.constant 0 : index
      %c0_64 = arith.constant 0 : index
      %96 = vector.load %arg15[%c0_63, %c0_64] : memref<1x1xf32, #tpu.memory_space<vmem>>, vector<1x1xf32>
      %c0_65 = arith.constant 0 : index
      %c0_66 = arith.constant 0 : index
      %c0_67 = arith.constant 0 : index
      %97 = vector.load %arg13[%c0_65, %c0_66, %c0_67] : memref<1x1x1xf32, #tpu.memory_space<vmem>>, vector<1x1x1xf32>
      %98 = vector.shape_cast %97 : vector<1x1x1xf32> to vector<1x1xf32>
      %99 = vector.shape_cast %96 : vector<1x1xf32> to vector<1x1x1xf32>
      tpu.vector_store %arg13[%c0_65, %c0_66, %c0_67], %99 {strides = array<i32>} : memref<1x1x1xf32, #tpu.memory_space<vmem>>, vector<1x1x1xf32>,
    } else {
    }
    return
  }
  func.func @transform_0(%arg0: i32, %arg1: i32) -> (i32, i32, i32) {
    %c0_i32 = arith.constant 0 : i32
    %c0_i32_0 = arith.constant 0 : i32
    %c0_i32_1 = arith.constant 0 : i32
    return %arg0, %c0_i32, %c0_i32_0 : i32, i32, i32
  }
  func.func @transform_1(%arg0: i32, %arg1: i32) -> (i32, i32, i32) {
    %c0_i32 = arith.constant 0 : i32
    %c0_i32_0 = arith.constant 0 : i32
    %c0_i32_1 = arith.constant 0 : i32
    return %arg0, %c0_i32, %c0_i32_0 : i32, i32, i32
  }
  func.func @transform_2(%arg0: i32, %arg1: i32) -> (i32, i32, i32) {
    %c0_i32 = arith.constant 0 : i32
    %c0_i32_0 = arith.constant 0 : i32
    %c0_i32_1 = arith.constant 0 : i32
    return %arg1, %c0_i32, %c0_i32_0 : i32, i32, i32
  }
  func.func @transform_3(%arg0: i32, %arg1: i32) -> (i32, i32, i32) {
    %c0_i32 = arith.constant 0 : i32
    %c0_i32_0 = arith.constant 0 : i32
    %c0_i32_1 = arith.constant 0 : i32
    return %arg1, %c0_i32, %c0_i32_0 : i32, i32, i32
  }
  func.func @transform_4(%arg0: i32, %arg1: i32) -> (i32, i32, i32, i32) {
    %c0_i32 = arith.constant 0 : i32
    %c0_i32_0 = arith.constant 0 : i32
    %c0_i32_1 = arith.constant 0 : i32
    %c0_i32_2 = arith.constant 0 : i32
    return %arg1, %c0_i32, %c0_i32_0, %c0_i32_1 : i32, i32, i32, i32
  }
  func.func @transform_5(%arg0: i32, %arg1: i32) -> (i32, i32, i32, i32) {
    %c0_i32 = arith.constant 0 : i32
    %c0_i32_0 = arith.constant 0 : i32
    %c0_i32_1 = arith.constant 0 : i32
    %c0_i32_2 = arith.constant 0 : i32
    return %arg1, %c0_i32, %c0_i32_0, %c0_i32_1 : i32, i32, i32, i32
  }
  func.func @transform_6(%arg0: i32, %arg1: i32) -> (i32, i32, i32, i32) {
    %c0_i32 = arith.constant 0 : i32
    %c0_i32_0 = arith.constant 0 : i32
    %c0_i32_1 = arith.constant 0 : i32
    %c0_i32_2 = arith.constant 0 : i32
    return %arg1, %c0_i32, %c0_i32_0, %c0_i32_1 : i32, i32, i32, i32
  }
  func.func @transform_7(%arg0: i32, %arg1: i32) -> (i32, i32, i32, i32) {
    %c0_i32 = arith.constant 0 : i32
    %c0_i32_0 = arith.constant 0 : i32
    %c0_i32_1 = arith.constant 0 : i32
    %c0_i32_2 = arith.constant 0 : i32
    return %arg1, %c0_i32, %c0_i32_0, %c0_i32_1 : i32, i32, i32, i32
  }
  func.func @transform_8(%arg0: i32, %arg1: i32) -> (i32, i32, i32) {
    %c0_i32 = arith.constant 0 : i32
    %c0_i32_0 = arith.constant 0 : i32
    %c0_i32_1 = arith.constant 0 : i32
    return %arg1, %c0_i32, %c0_i32_0 : i32, i32, i32
  }
  func.func @transform_9(%arg0: i32, %arg1: i32) -> (i32, i32, i32) {
    %c0_i32 = arith.constant 0 : i32
    %c0_i32_0 = arith.constant 0 : i32
    %c0_i32_1 = arith.constant 0 : i32
    return %arg1, %c0_i32, %c0_i32_0 : i32, i32, i32
  }
  func.func @transform_10(%arg0: i32, %arg1: i32) -> (i32, i32, i32) {
    %c0_i32 = arith.constant 0 : i32
    %c0_i32_0 = arith.constant 0 : i32
    %c0_i32_1 = arith.constant 0 : i32
    return %arg0, %c0_i32, %c0_i32_0 : i32, i32, i32
  }
  func.func @transform_11(%arg0: i32, %arg1: i32) -> (i32, i32, i32) {
    %c0_i32 = arith.constant 0 : i32
    %c0_i32_0 = arith.constant 0 : i32
    %c0_i32_1 = arith.constant 0 : i32
    return %arg0, %c0_i32, %c0_i32_0 : i32, i32, i32
  }
}

</mosaic_0001>

<bundles_post_ra>
// kernel: tpu_custom_call.1
= control target key start
LH: loop header
LB: loop body
LE: loop exit
PB: predicated region body
PF: predicated region fallthrough
CT: control target
= control target key end

     0   :  { %s4117_s0 = inlined_call_operand.vmem [shape: f32[2,16,128], index: 0, kind: input, shape index: {}]   ;;  %s4118_s1 = inlined_call_operand.vmem [shape: f32[2,1,128], index: 1, kind: input, shape index: {}]   ;;  %s4119_s2 = inlined_call_operand.vmem [shape: f32[2,48,16], index: 2, kind: input, shape index: {}]   ;;  %s4120_s3 = inlined_call_operand.vmem [shape: f32[2,48,1], index: 3, kind: input, shape index: {}]   ;;  %s4121_s4 = inlined_call_operand.vmem [shape: f32[2,12,64,32], index: 4, kind: input, shape index: {}]   ;;  %s4122_s5 = inlined_call_operand.vmem [shape: f32[2,4,64,1], index: 5, kind: input, shape index: {}]   ;;  %s4123_s6 = inlined_call_operand.vmem [shape: f32[2,4,64,32], index: 6, kind: input, shape index: {}]   ;;  %s4124_s7 = inlined_call_operand.vmem [shape: f32[2,4,64,1], index: 7, kind: input, shape index: {}]   ;;  %s4125_s8 = inlined_call_operand.vmem [shape: f32[2,16,32], index: 8, kind: input, shape index: {}]   ;;  %s4126_s9 = inlined_call_operand.vmem [shape: f32[2,16,1], index: 9, kind: input, shape index: {}]   ;;  %s4127_s10 = inlined_call_operand.hbm [shape: f32[2,16,128], index: 10, kind: output, shape index: {0}]   ;;  %s4128_s11 = inlined_call_operand.vmem [shape: f32[2,1,1], index: 11, kind: output, shape index: {1}]  }
   0x1   :  { %4143 = sst [smem:[#allocation19_spill]] %s4117_s0 }
   0x2   :  { %4144 = sst [smem:[#allocation20_spill]] %s4118_s1 }
   0x3   :  { %4145 = sst [smem:[#allocation21_spill]] %s4119_s2 }
   0x4   :  { %4146 = sst [smem:[#allocation22_spill]] %s4120_s3 }
   0x5   :  { %4147 = sst [smem:[#allocation23_spill]] %s4121_s4 }
   0x6   :  { %4148 = sst [smem:[#allocation24_spill]] %s4127_s10 }
   0x7   :  { %17 = vsyncpa [#allocation5], 0 }
   0x8   :  { %19 = vsyncpa [#allocation5 + $0x1], 0  ;;  %s3616_s17 = smov 0   ;;  %s3618_s18 = smov 0  }
   0x9   :  { %s3620_s19 = smov 0   ;;  %s3622_s20 = smov 0  }
   0xa   :  { %s3624_s21 = smov 0   ;;  %s3626_s22 = smov 0  }
   0xb   :  { %s3628_s23 = smov 0   ;;  %s3630_s24 = smov 0  }
   0xc LB: > { %4149 = sst [smem:[#allocation7_spill]] %s3480_s17  ;;  %s2561_s25 = sadd.s32 4294967295, %s3508_s24   ;;  %s3508_s24 = sphi %s3630_s24, %s25_s24   ;;  %s3504_s23 = sphi %s3628_s23, %s4195_s23   ;;  %s3500_s22 = sphi %s3626_s22, %s4194_s22   ;;  %s3496_s21 = sphi %s3624_s21, %s4193_s21   ;;  %s3492_s20 = sphi %s3622_s20, %s4192_s20   ;;  %s3488_s19 = sphi %s3620_s19, %s4191_s19   ;;  %s3484_s18 = sphi %s3618_s18, %s4190_s18   ;;  %s3480_s17 = sphi %s3616_s17, %s4189_s17  }
   0xd   : > { %4150 = sst [smem:[#allocation8_spill]] %s3484_s18  ;;  %s2562_s26 = sadd.s32 4294967294, %s3508_s24  }
   0xe   : > { %4151 = sst [smem:[#allocation9_spill]] %s3488_s19  ;;  %s34_s27 = sadd.s32 1, %s3500_s22 }
   0xf   : > { %4152 = sst [smem:[#allocation10_spill]] %s3496_s21  ;;  %p35_p0 = scmp.ge.s32.totalorder %s34_s27, 2 }
  0x10   : > { %4153 = sst [smem:[#allocation11_spill]] %s3500_s22  ;;  %s37_s28 = sadd.s32 1, %s3504_s23 }
  0x11   : > { %4154 = sst [smem:[#allocation12_spill]] %s3504_s23  ;;  %p314_p1 = scmp.ne.s32.totalorder %s3488_s19, %s3484_s18 }
  0x12   : > { %4155 = sst [smem:[#allocation13_spill]] %s3508_s24  ;;  %p315_p2 = scmp.eq.s32.totalorder %s2561_s25, 3 }
  0x13   : > { %s4197_s27 = smov (%p35_p0, %s34_s27), 0  ;;  %s4199_s28 = smov (!%p35_p0, %s37_s28), %s3504_s23 }
  0x14   : > { %4156 = sst [smem:[#allocation14_spill]] %s4197_s27  ;;  %p3665_p3 = por %p315_p2, %p314_p1 }
  0x15   : > { %p320_p4 = scmp.ne.s32.totalorder %s3484_s18, %s3480_s17  ;;  %p39_p5 = scmp.ge.s32.totalorder %s4199_s28, 2 }
  0x16   : > { %s4157_s29 = scalar_select %p3665_p3, 1, 0 }
  0x17   : > { %p321_p6 = scmp.eq.s32.totalorder %s2562_s26, 3  ;;  %p2565_p7 = scmp.ge.s32.totalorder %s3508_s24, 1 }
  0x18   : > { %4158 = sst [smem:[#allocation15_spill]] %s4157_s29  ;;  %p443_p8 = scmp.lt.s32.totalorder %s3508_s24, 5 }
  0x19   : > { %s4201_s28 = smov (%p39_p5, %s4199_s28), 0  ;;  %p3675_p9 = por %p321_p6, %p320_p4 }
  0x1a   : > { %4159 = sst [smem:[#allocation16_spill]] %s4201_s28  ;;  %p444_p10 = pnand %p2565_p7, %p443_p8 }
  0x1b   : > { %s4160_s30 = scalar_select %p3675_p9, 1, 0 }
  0x1c   : > { %s301_s12 = ssub.s32 %s3504_s23, %s4201_s28  ;;  %s304_s13 = sadd.s32 1, %s3488_s19 }
  0x1d   : > { %4161 = sst [smem:[#allocation17_spill]] %s4160_s30  ;;  %p302_p11 = scmp.eq.s32.totalorder %s301_s12, 0 }
  0x1e   : > { %447 = sbr.rel (%p444_p10) target bundleno = 1955 (0x7a3), region = 60  ;;  %s4133_s15 = sand.u32 (!%p444_p10), 1, %s3484_s18  }
  0x1f   : > { %s3683_s14 = scalar_select %p302_p11, %s3488_s19, %s304_s13  }
  0x20   : > { %p529_p12 = scmp.lt.s32.totalorder (!%p444_p10), %s3496_s21, 1  ;;  %s2566_s16 = sshll.u32 (!%p444_p10), %s4133_s15, 4 }
  0x21   : > { %4162 = sst [smem:[#allocation18_spill]] %s3683_s14  ;;  %p537_p13 = scmp.lt.s32.totalorder (!%p444_p10), %s3492_s20, 1 }
  0x22   : > { %s4163_s1 = sld [smem:[#allocation20_spill]] (!%p444_p10)  ;;  %s4164_s0 = sld [smem:[#allocation19_spill]] (!%p444_p10) }
  0x23   : > { %s4165_s2 = sld [smem:[#allocation21_spill]] (!%p444_p10)  ;;  %s4166_s3 = sld [smem:[#allocation22_spill]] (!%p444_p10) }
  0x24   : > { %s4167_s4 = sld [smem:[#allocation23_spill]] (!%p444_p10)  ;;  %p2582_p0 = scmp.ne.s32.totalorder (!%p444_p10), %s3492_s20, 0 }
  0x25   : > { %s3691_s25 = scalar_select %p529_p12, %s3496_s21, 1 }
  0x26   : > { %s538_s26 = scalar_select %p537_p13, %s3492_s20, 1 }
  0x27   : > { %s2727_s12 = sshll.u32 %s3691_s25, 4  ;;  %vm589_vm0 = vcmask (!%p2582_p0), 0   ;;  %v3546_v3 = vmov (!%p2582_p0), 0.0  }
  0x28   : > { %s536_s27 = scalar_lea.vmem %s4163_s1, %s3691_s25  ;;  %s533_s14 = scalar_lea.vmem %s4164_s0, %s2727_s12  ;;  %590 = vst.msk [vmem:[#allocation3] sm:$0x1] (!%p2582_p0), %vm589_vm0, %v3546_v3 }
  0x29   : > { %s3128_s19 = smul.u32 48, %s538_s26  ;;  %v3702_v0 = vld [vmem:[%s536_s27] ss:$0 sm:$0xff]  ;;  %s2728_s30 = sshll.u32 %s538_s26, 8  ;;  %v586_v2 = vld [vmem:[%s533_s14 + $0x8] sm:$0xff] (!%p2582_p0) }
  0x2a   : > { %s3129_s15 = smul.u32 768, %s538_s26  ;;  %s3722_s12 = scalar_lea.vmem %s4122_s5, %s2728_s30  ;;  %v585_v1 = vld [vmem:[%s533_s14] sm:$0xff] (!%p2582_p0)  ;;  %588 = vst [vmem:[#allocation2 + $0x8] sm:$0xff] (!%p2582_p0), %v586_v2 }
  0x2b   : > { %s3707_s10 = scalar_lea.vmem %s4165_s2, %s3128_s19  ;;  %s3712_s21 = scalar_lea.vmem %s4166_s3, %s3128_s19  ;;  %587 = vst [vmem:[#allocation2] sm:$0xff] (!%p2582_p0), %v585_v1 }
  0x2c   : > { %s3717_s22 = scalar_lea.vmem %s4167_s4, %s3129_s15  ;;  %s3727_s17 = scalar_lea.vmem %s4123_s6, %s2728_s30 }
  0x2d   : > { %s3732_s18 = scalar_lea.vmem %s4124_s7, %s2728_s30  ;;  %s2731_s19 = sshll.u32 %s538_s26, 4 }
  0x2e   : > { %s579_s15 = scalar_lea.vmem %s4128_s11, %s3691_s25  ;;  %s3741_s23 = scalar_lea.vmem %s4125_s8, %s2731_s19 }
  0x2f   : > { %s3746_s0 = scalar_lea.vmem %s4126_s9, %s2731_s19  ;;  %s3748_s1 = scalar_lea.vmem [#allocation4], %s2566_s16 }
  0x30   : > { %584 = sbr.rel (%p2582_p0) target bundleno = 55 (0x37), region = 64 }
  0x37 PF: > { %v591_v4 = vld [vmem:[#allocation2] sm:$0xff]  ;;  %v592_v5 = vld [vmem:[#allocation2 + $0x8] sm:$0xff]  ;;  %vm635_vm1 = vcmask 130048   ;;  %v595_v8 = vld [vmem:[%s3707_s10 + $0x10] sm:$0xff]  ;;  %v3547_v9 = vmov 0   ;;  %v3781_v44 = vmov 0.0  }
  0x38   : > { %v593_v6 = vld [vmem:[%s3707_s10] sm:$0xff]  ;;  %v3018_v7 = vpack.c.bf16 %v592_v5, %v591_v4  ;;  %3283 = vset.pattern.permute.xlu1 %v3547_v9  ;;  %2847 = vmatprep.mubr.msk.f32.mxu1 %vm635_vm1, %v595_v8  ;;  %v601_v10 = vld [vmem:[%s3712_s21 + $0x10] sm:$0xff]  ;;  %v594_v12 = vld [vmem:[%s3707_s10 + $0x8] sm:$0xff]  ;;  %v3783_v45 = vmov 0.0   ;;  %v3785_v46 = vmov 0.0   ;;  %v3787_v47 = vmov 0.0  }
  0x39   : > { %2844 = vmatprep.mubr.msk.f32.mxu0 %vm635_vm1, %v593_v6  ;;  %3282 = vset.pattern.permute.xlu0 %v3547_v9  ;;  %v599_v11 = vld [vmem:[%s3712_s21] sm:$0xff]  ;;  %v596_v13 = vld [vmem:[%s3707_s10 + $0x18] sm:$0xff]  ;;  %v600_v16 = vld [vmem:[%s3712_s21 + $0x8] sm:$0xff]  ;;  %s3797_s2 = smov 0  }
  0x3a   : > { %3019 = vmatprep.subr.bf16.mxu0 %v3018_v7  ;;  %3094 = vmatprep.subr.bf16.mxu1 %v3018_v7  ;;  %v597_v14 = vld [vmem:[%s3707_s10 + $0x20] sm:$0xff]  ;;  %v602_v15 = vld [vmem:[%s3712_s21 + $0x18] sm:$0xff]  ;;  %v598_v17 = vld [vmem:[%s3707_s10 + $0x28] sm:$0xff] }
  0x3b   : > { %3021 = vmatpush3.bf16.msra.mxu0 %v3018_v7  ;;  %3095 = vmatpush3.bf16.msra.mxu1 %v3018_v7  ;;  %v604_v18 = vld [vmem:[%s3712_s21 + $0x28] sm:$0xff]  ;;  %v603_v19 = vld [vmem:[%s3712_s21 + $0x20] sm:$0xff] }
  0x3c   : > { %617 = vperm.xlu1 %3283, %v601_v10   ;;  %607 = vperm.xlu0 %3282, %v599_v11  }
  0x3e   : > { %2845 = vmatmul.mubr.msk.f32.vlgmr.msra.gmra.mrb[0].mxu0 %vm635_vm1, %v594_v12  ;;  %2848 = vmatmul.mubr.msk.f32.vlgmr.msra.gmra.mrb[0].mxu1 %vm635_vm1, %v596_v13 }
  0x3f   : > { %2850 = vmatprep.mubr.msk.f32.mxu1 %vm635_vm1, %v597_v14 }
  0x40   : > { %622 = vperm.xlu1 %3283, %v602_v15   ;;  %612 = vperm.xlu0 %3282, %v600_v16  }
  0x42   : > { %2851 = vmatmul.mubr.msk.f32.gmra.mrb[2].mxu1 %vm635_vm1, %v598_v17 }
  0x44   : > { %632 = vperm.xlu1 %3283, %v604_v18   ;;  %627 = vperm.xlu0 %3282, %v603_v19  }
  0xbb   : > { %v618_v20 = vpop.permute.xlu1 %617  ;;  %v608_v21 = vpop.permute.xlu0 %607 }
  0xbf   : > { %v623_v22 = vpop.permute.xlu1 %622  ;;  %v613_v23 = vpop.permute.xlu0 %612 }
  0xc3   : > { %v633_v34 = vpop.permute.xlu1 %632  ;;  %v628_v38 = vpop.permute.xlu0 %627 }
 0x111   : > { %v2846_v24 = vpop.f32.mrb[0].mxu0  ;;  %v2849_v25 = vpop.f32.mrb[0].mxu1 }
 0x112   : > { %v726_v26 = vadd.f32 %v2846_v24, %v613_v23  ;;  %v736_v27 = vadd.f32 %v2849_v25, %v623_v22  ;;  %v720_v28 = vpop.f32.mrb[1].mxu0  ;;  %v730_v29 = vpop.f32.mrb[1].mxu1 }
 0x113   : > { %v721_v30 = vadd.f32 %v720_v28, %v608_v21  ;;  %v731_v31 = vadd.f32 %v730_v29, %v618_v20 }
 0x114   : > { %v3772_v32 = vmul.f32 %v3702_v0, %v726_v26  ;;  %v758_v33 = vmul.f32 %v3702_v0, %v736_v27  }
 0x115   : > { %v3776_v35 = vmul.f32 %v3702_v0, %v721_v30  ;;  %v757_v36 = vmul.f32 %v3702_v0, %v731_v31   ;;  %v2852_v37 = vpop.f32.mrb[2].mxu1 }
 0x116   : > { %v746_v39 = vadd.f32 %v2852_v37, %v633_v34  ;;  %v740_v40 = vpop.f32.mrb[3].mxu1 }
 0x117   : > { %v741_v41 = vadd.f32 %v740_v40, %v628_v38 }
 0x118   : > { %v760_v42 = vmul.f32 %v3702_v0, %v746_v39  }
 0x119   : > { %v759_v43 = vmul.f32 %v3702_v0, %v741_v41  }
 0x11a LB: >> { %v3284_v48 = vpack.i.bf16 %v3536_v33, %v3540_v36  ;;  %s2590_s3 = smul.u32 192, %s3544_s2  ;;  %s3548_s4 = smov 1   ;;  %v3289_v49 = vpack.i.bf16 %v3528_v42, %v3532_v43  ;;  %vm805_vm2 = vcmask 261120   ;;  %v3022_v51 = vpack.c.bf16 %v3536_v33, %v3540_v36  ;;  %s3544_s2 = sphi %s3797_s2, %s766_s2   ;;  %v3540_v36 = vphi %v757_v36, %v4179_v36   ;;  %v3536_v33 = vphi %v758_v33, %v4178_v33   ;;  %v3532_v43 = vphi %v759_v43, %v4177_v43   ;;  %v3528_v42 = vphi %v760_v42, %v4176_v42   ;;  %v3524_v47 = vphi %v3787_v47, %v4175_v47   ;;  %v3520_v46 = vphi %v3785_v46, %v4174_v46   ;;  %v3516_v45 = vphi %v3783_v45, %v4173_v45   ;;  %v3512_v44 = vphi %v3781_v44, %v4172_v44  }
 0x11b   : >> { %s3549_s10 = smov 127   ;;  %v3026_v52 = vpack.c.bf16 %v3528_v42, %v3532_v43  ;;  %s3857_s30 = sshll.u32 %s3544_s2, 6  ;;  %v3550_v61 = vmov 0  }
 0x11c   : >> { %3285 = vrot.lane.b32.xlu0 %v3284_v48, %s3548_s4  ;;  %3295 = vrot.lane.b32.xlu1 %v3284_v48, %s3549_s10  ;;  %s3832_s21 = scalar_lea.vmem %s3717_s22, %s2590_s3  ;;  %s1221_s14 = scalar_lea.vmem %s3722_s12, %s3857_s30 }
 0x11d   : >> { %v786_v50 = vld [vmem:[%s3832_s21] sm:$0xff]  ;;  %3023 = vmatprep.subr.bf16.mxu1 %v3022_v51  ;;  %v2593_v54 = vld [vmem:[%s3832_s21 + $0x48] sm:$0xff]  ;;  %v2594_v55 = vld [vmem:[%s3832_s21 + $0x50] sm:$0xff]  ;;  %3305 = vset.pattern.permute.xlu1 %v3550_v61  ;;  %s1319_s16 = scalar_lea.vmem %s3732_s18, %s3857_s30  ;;  %s3895_s26 = scalar_lea.vmem %s3727_s17, %s3857_s30 }
 0x11e   : >> { %2881 = vmatprep.mubr.msk.f32.mxu0 %vm805_vm2, %v786_v50  ;;  %3025 = vmatpush3.bf16.msra.mxu1 %v3022_v51  ;;  %v2592_v53 = vld [vmem:[%s3832_s21 + $0x40] sm:$0xff]  ;;  %v2595_v56 = vld [vmem:[%s3832_s21 + $0x58] sm:$0xff]  ;;  %v2597_v58 = vld [vmem:[%s3832_s21 + $0x68] sm:$0xff]  ;;  %s766_s2 = sadd.s32 1, %s3544_s2  }
 0x11f   : >> { %3027 = vmatprep.subr.bf16.mxu1 %v3026_v52  ;;  %2861 = vmatprep.mubr.msk.f32.mxu1 %vm805_vm2, %v2592_v53  ;;  %v2596_v57 = vld [vmem:[%s3832_s21 + $0x60] sm:$0xff]  ;;  %v2598_v59 = vld [vmem:[%s3832_s21 + $0x70] sm:$0xff]  ;;  %v2599_v60 = vld [vmem:[%s3832_s21 + $0x78] sm:$0xff]  ;;  %p763_p1 = scmp.ge.s32.totalorder %s766_s2, 3  }
 0x120   : >> { %3290 = vrot.lane.b32.xlu0 %v3289_v49, %s3548_s4  ;;  %3300 = vrot.lane.b32.xlu1 %v3289_v49, %s3549_s10  ;;  %v1227_v62 = vld [vmem:[%s1221_s14 + $0x28] sm:$0xff]  ;;  %v1226_v63 = vld [vmem:[%s1221_s14 + $0x20] sm:$0xff]  ;;  %s3551_s24 = smov (%p763_p1), 1   ;;  %s3552_s19 = smov (%p763_p1), 127   ;;  %vm2283_vm3 = vcmask (%p763_p1), 0  }
 0x121   : >> { %3304 = vset.pattern.permute.xlu0 %v3550_v61  ;;  %v1228_v1 = vld [vmem:[%s1221_s14 + $0x30] sm:$0xff]  ;;  %v1229_v2 = vld [vmem:[%s1221_s14 + $0x38] sm:$0xff]  ;;  %v1222_v3 = vld [vmem:[%s1221_s14] sm:$0xff]  ;;  %p2720_p2 = scmp.ge.s32.totalorder (%p763_p1), %s3492_s20, 1 }
 0x122   : >> { %3029 = vmatpush3.bf16.msra.mxu1 %v3026_v52  ;;  %v1223_v4 = vld [vmem:[%s1221_s14 + $0x8] sm:$0xff]  ;;  %v1224_v5 = vld [vmem:[%s1221_s14 + $0x10] sm:$0xff]  ;;  %v1225_v6 = vld [vmem:[%s1221_s14 + $0x18] sm:$0xff] }
 0x123   : >> { %v1320_v7 = vld [vmem:[%s1319_s16] sm:$0xff]  ;;  %v1321_v8 = vld [vmem:[%s1319_s16 + $0x8] sm:$0xff]  ;;  %v1322_v10 = vld [vmem:[%s1319_s16 + $0x10] sm:$0xff] }
 0x124   : >> { %1257 = vperm.xlu1 %3305, %v1227_v62   ;;  %1252 = vperm.xlu0 %3304, %v1226_v63   ;;  %v1323_v11 = vld [vmem:[%s1319_s16 + $0x18] sm:$0xff]  ;;  %v1324_v12 = vld [vmem:[%s1319_s16 + $0x20] sm:$0xff]  ;;  %v1325_v13 = vld [vmem:[%s1319_s16 + $0x28] sm:$0xff] }
 0x125   : >> { %2862 = vmatmul.mubr.msk.f32.vlgmr.msra.gmra.mrb[0].mxu1 %vm805_vm2, %v2593_v54  ;;  %v1326_v14 = vld [vmem:[%s1319_s16 + $0x30] sm:$0xff]  ;;  %v1327_v15 = vld [vmem:[%s1319_s16 + $0x38] sm:$0xff]  ;;  %v787_v31 = vld [vmem:[%s3832_s21 + $0x8] sm:$0xff] }
 0x126   : >> { %2864 = vmatprep.mubr.msk.f32.mxu1 %vm805_vm2, %v2594_v55  ;;  %v788_v34 = vld [vmem:[%s3832_s21 + $0x10] sm:$0xff]  ;;  %v789_v38 = vld [vmem:[%s3832_s21 + $0x18] sm:$0xff]  ;;  %v790_v39 = vld [vmem:[%s3832_s21 + $0x20] sm:$0xff] }
 0x127   : >> { %v791_v40 = vld [vmem:[%s3832_s21 + $0x28] sm:$0xff]  ;;  %v792_v41 = vld [vmem:[%s3832_s21 + $0x30] sm:$0xff]  ;;  %v793_v48 = vld [vmem:[%s3832_s21 + $0x38] sm:$0xff] }
 0x128   : >> { %1262 = vperm.xlu1 %3305, %v1228_v1   ;;  %1267 = vperm.xlu0 %3304, %v1229_v2   ;;  %v2617_v49 = vld [vmem:[%s3832_s21 + $0x80] sm:$0xff]  ;;  %v2618_v50 = vld [vmem:[%s3832_s21 + $0x88] sm:$0xff]  ;;  %v2619_v51 = vld [vmem:[%s3832_s21 + $0x90] sm:$0xff] }
 0x129   : >> { %2865 = vmatmul.mubr.msk.f32.gmra.mrb[2].mxu1 %vm805_vm2, %v2595_v56  ;;  %v2620_v52 = vld [vmem:[%s3832_s21 + $0x98] sm:$0xff]  ;;  %v2621_v53 = vld [vmem:[%s3832_s21 + $0xa0] sm:$0xff]  ;;  %v2622_v54 = vld [vmem:[%s3832_s21 + $0xa8] sm:$0xff] }
 0x12a   : >> { %2867 = vmatprep.mubr.msk.f32.mxu1 %vm805_vm2, %v2596_v57  ;;  %v2623_v55 = vld [vmem:[%s3832_s21 + $0xb0] sm:$0xff]  ;;  %v2624_v56 = vld [vmem:[%s3832_s21 + $0xb8] sm:$0xff]  ;;  %v1311_v2 = vld [vmem:[%s3895_s26] sm:$0xff] }
 0x12c   : >> { %1232 = vperm.xlu1 %3305, %v1222_v3   ;;  %1237 = vperm.xlu0 %3304, %v1223_v4  }
 0x12d   : >> { %2868 = vmatmul.mubr.msk.f32.gmra.mrb[4].mxu1 %vm805_vm2, %v2597_v58 }
 0x12e   : >> { %2870 = vmatprep.mubr.msk.f32.mxu1 %vm805_vm2, %v2598_v59 }
 0x130   : >> { %1242 = vperm.xlu1 %3305, %v1224_v5   ;;  %1247 = vperm.xlu0 %3304, %v1225_v6  }
 0x131   : >> { %2871 = vmatmul.mubr.msk.f32.gmra.mrb[6].mxu1 %vm805_vm2, %v2599_v60 }
 0x132   : >> { %2921 = vmatprep.mubr.msk.f32.mxu1 %vm805_vm2, %v1311_v2 }
 0x134   : >> { %1330 = vperm.xlu1 %3305, %v1320_v7   ;;  %1335 = vperm.xlu0 %3304, %v1321_v8  }
 0x138   : >> { %1340 = vperm.xlu1 %3305, %v1322_v10   ;;  %1345 = vperm.xlu0 %3304, %v1323_v11  }
 0x13c   : >> { %1350 = vperm.xlu1 %3305, %v1324_v12   ;;  %1355 = vperm.xlu0 %3304, %v1325_v13  }
 0x140   : >> { %1360 = vperm.xlu1 %3305, %v1326_v14   ;;  %1365 = vperm.xlu0 %3304, %v1327_v15  }
 0x144   : > { %3351 = vset.pattern.permute.xlu1 (%p763_p1), %v3547_v9  ;;  %3350 = vset.pattern.permute.xlu0 (%p763_p1), %v3547_v9  ;;  %v2654_v9 = vld [vmem:[%s3717_s22 + $0x280] sm:$0xff] (%p763_p1) }
 0x18e   : >> { %v3286_v16 = vpop.permute.xlu0 %3285  ;;  %v3296_v17 = vpop.permute.xlu1 %3295 }
 0x18f   : >> { %v3288_v18 = vunpack.i.h.bf16 %v3286_v16  ;;  %v3287_v19 = vunpack.i.l.bf16 %v3286_v16  ;;  %v3298_v21 = vunpack.i.h.bf16 %v3296_v17  ;;  %v3297_v22 = vunpack.i.l.bf16 %v3296_v17 }
 0x191   : >> { %v3030_v20 = vpack.c.bf16 %v3288_v18, %v3287_v19  ;;  %v3038_v28 = vpack.c.bf16 %v3298_v21, %v3297_v22 }
 0x192   : >> { %v3291_v23 = vpop.permute.xlu0 %3290  ;;  %v3301_v24 = vpop.permute.xlu1 %3300 }
 0x193   : >> { %v3293_v25 = vunpack.i.h.bf16 %v3291_v23  ;;  %v3292_v26 = vunpack.i.l.bf16 %v3291_v23  ;;  %3031 = vmatprep.subr.bf16.mxu0 %v3030_v20  ;;  %v3303_v29 = vunpack.i.h.bf16 %v3301_v24  ;;  %v3302_v30 = vunpack.i.l.bf16 %v3301_v24 }
 0x194   : >> { %3033 = vmatpush3.bf16.msra.mxu0 %v3030_v20 }
 0x195   : >> { %v3034_v27 = vpack.c.bf16 %v3293_v25, %v3292_v26  ;;  %v3042_v37 = vpack.c.bf16 %v3303_v29, %v3302_v30 }
 0x197   : >> { %3035 = vmatprep.subr.bf16.mxu0 %v3034_v27 }
 0x198   : >> { %3037 = vmatpush3.bf16.msra.mxu0 %v3034_v27 }
 0x199   : >> { %3039 = vmatprep.subr.bf16.mxu0 %v3038_v28 }
 0x19b   : >> { %2882 = vmatmul.mubr.msk.f32.vlgmr.msra.gmra.mrb[0].mxu0 %vm805_vm2, %v787_v31 }
 0x19c   : >> { %2884 = vmatprep.mubr.msk.f32.mxu0 %vm805_vm2, %v788_v34  ;;  %3041 = vmatpush3.bf16.msra.mxu0 %v3038_v28 }
 0x19d   : >> { %3043 = vmatprep.subr.bf16.mxu0 %v3042_v37 }
 0x19f   : >> { %2885 = vmatmul.mubr.msk.f32.gmra.mrb[2].mxu0 %vm805_vm2, %v789_v38 }
 0x1a0   : >> { %2887 = vmatprep.mubr.msk.f32.mxu0 %vm805_vm2, %v790_v39  ;;  %3045 = vmatpush3.bf16.msra.mxu0 %v3042_v37 }
 0x1a3   : >> { %2888 = vmatmul.mubr.msk.f32.gmra.mrb[4].mxu0 %vm805_vm2, %v791_v40  ;;  %v1253_v12 = vpop.permute.xlu0 %1252  ;;  %v1258_v13 = vpop.permute.xlu1 %1257 }
 0x1a4   : >> { %2890 = vmatprep.mubr.msk.f32.mxu0 %vm805_vm2, %v792_v41 }
 0x1a7   : >> { %2891 = vmatmul.mubr.msk.f32.gmra.mrb[6].mxu0 %vm805_vm2, %v793_v48  ;;  %v1268_v21 = vpop.permute.xlu0 %1267  ;;  %v1263_v25 = vpop.permute.xlu1 %1262 }
 0x1a8   : >> { %2901 = vmatprep.mubr.msk.f32.mxu0 %vm805_vm2, %v2617_v49 }
 0x1ab   : >> { %2902 = vmatmul.mubr.msk.f32.vlgmr.msra.gmra.mrb[0].mxu0 %vm805_vm2, %v2618_v50  ;;  %v1238_v34 = vpop.permute.xlu0 %1237  ;;  %v1233_v37 = vpop.permute.xlu1 %1232 }
 0x1ac   : >> { %2904 = vmatprep.mubr.msk.f32.mxu0 %vm805_vm2, %v2619_v51 }
 0x1af   : >> { %2905 = vmatmul.mubr.msk.f32.gmra.mrb[2].mxu0 %vm805_vm2, %v2620_v52  ;;  %v1248_v41 = vpop.permute.xlu0 %1247  ;;  %v1243_v49 = vpop.permute.xlu1 %1242 }
 0x1b0   : >> { %2907 = vmatprep.mubr.msk.f32.mxu0 %vm805_vm2, %v2621_v53 }
 0x1b3   : >> { %2908 = vmatmul.mubr.msk.f32.gmra.mrb[4].mxu0 %vm805_vm2, %v2622_v54 }
 0x1b4   : >> { %2910 = vmatprep.mubr.msk.f32.mxu0 %vm805_vm2, %v2623_v55 }
 0x1b7   : >> { %2911 = vmatmul.mubr.msk.f32.gmra.mrb[6].mxu0 %vm805_vm2, %v2624_v56 }
 0x1f8   : >> { %v2863_v57 = vpop.f32.mrb[0].mxu1 }
 0x1f9   : >> { %v896_v58 = vpop.f32.mrb[1].mxu1 }
 0x1fc   : >> { %v2866_v59 = vpop.f32.mrb[2].mxu1 }
 0x1fd   : >> { %v906_v60 = vpop.f32.mrb[3].mxu1 }
 0x200   : >> { %v2869_v61 = vpop.f32.mrb[4].mxu1 }
 0x201   : >> { %v916_v62 = vpop.f32.mrb[5].mxu1 }
 0x204   : >> { %v2872_v63 = vpop.f32.mrb[6].mxu1 }
 0x205   : >> { %v926_v1 = vpop.f32.mrb[7].mxu1 }
 0x27e   : >> { %v2903_v3 = vpop.f32.mrb[0].mxu0 }
 0x27f   : >> { %v3096_v4 = vadd.f32 %v2903_v3, %v2863_v57  ;;  %v1173_v5 = vpop.f32.mrb[1].mxu0 }
 0x280   : >> { %v3097_v6 = vadd.f32 %v1173_v5, %v896_v58 }
 0x281   : >> { %v1271_v38 = vadd.f32 %v3096_v4, %v1238_v34 }
 0x282   : >> { %v2906_v7 = vpop.f32.mrb[2].mxu0  ;;  %v1270_v39 = vadd.f32 %v3097_v6, %v1233_v37 }
 0x283   : >> { %v3098_v8 = vadd.f32 %v2906_v7, %v2866_v59  ;;  %v1183_v10 = vpop.f32.mrb[3].mxu0 }
 0x284   : >> { %v3099_v11 = vadd.f32 %v1183_v10, %v906_v60  ;;  %v1312_v10 = vld [vmem:[%s3895_s26 + $0x8] sm:$0xff] }
 0x285   : >> { %v1273_v50 = vadd.f32 %v3098_v8, %v1248_v41 }
 0x286   : >> { %v2909_v14 = vpop.f32.mrb[4].mxu0  ;;  %v1272_v52 = vadd.f32 %v3099_v11, %v1243_v49  ;;  %v1313_v11 = vld [vmem:[%s3895_s26 + $0x10] sm:$0xff] }
 0x287   : >> { %v3100_v15 = vadd.f32 %v2909_v14, %v2869_v61  ;;  %v1193_v16 = vpop.f32.mrb[5].mxu0  ;;  %v1316_v14 = vld [vmem:[%s3895_s26 + $0x28] sm:$0xff] }
 0x288   : >> { %v3101_v17 = vadd.f32 %v1193_v16, %v916_v62  ;;  %v1318_v16 = vld [vmem:[%s3895_s26 + $0x38] sm:$0xff] }
 0x289   : >> { %v1275_v18 = vadd.f32 %v3100_v15, %v1258_v13  ;;  %v1315_v13 = vld [vmem:[%s3895_s26 + $0x20] sm:$0xff]  ;;  %v1317_v15 = vld [vmem:[%s3895_s26 + $0x30] sm:$0xff] }
 0x28a   : >> { %v1274_v19 = vadd.f32 %v3101_v17, %v1253_v12  ;;  %v2912_v20 = vpop.f32.mrb[6].mxu0  ;;  %v1314_v12 = vld [vmem:[%s3895_s26 + $0x18] sm:$0xff]  ;;  %v1336_v17 = vpop.permute.xlu0 %1335 }
 0x28b   : >> { %v2635_v22 = vmul.f32 -1.442695, %v1275_v18  ;;  %v3102_v23 = vadd.f32 %v2912_v20, %v2872_v63  ;;  %v1203_v24 = vpop.f32.mrb[7].mxu0  ;;  %v1331_v18 = vpop.permute.xlu1 %1330 }
 0x28c   : >> { %v2634_v26 = vmul.f32 -1.442695, %v1274_v19  ;;  %v3103_v27 = vadd.f32 %v1203_v24, %v926_v1 }
 0x28d   : >> { %3306 = vpow2.f32 %v2635_v22  ;;  %v1277_v28 = vadd.f32 %v3102_v23, %v1268_v21 }
 0x28e   : >> { %3308 = vpow2.f32 %v2634_v26  ;;  %v1276_v29 = vadd.f32 %v3103_v27, %v1263_v25  ;;  %v1346_v19 = vpop.permute.xlu0 %1345 }
 0x28f   : >> { %v2637_v30 = vmul.f32 -1.442695, %v1277_v28  ;;  %v1341_v21 = vpop.permute.xlu1 %1340 }
 0x290   : >> { %v2636_v31 = vmul.f32 -1.442695, %v1276_v29 }
 0x291   : >> { %3310 = vpow2.f32 %v2637_v30 }
 0x292   : >> { %3312 = vpow2.f32 %v2636_v31  ;;  %v1356_v31 = vpop.permute.xlu0 %1355 }
 0x293   : >> { %3314 = vtanh.f32 %v1271_v38  ;;  %v1351_v38 = vpop.permute.xlu1 %1350 }
 0x294   : >> { %3316 = vtanh.f32 %v1270_v39 }
 0x297   : >> { %v3307_v40 = vpop.eup %3306 }
 0x298   : >> { %v3309_v48 = vpop.eup %3308  ;;  %v1295_v51 = vadd.f32 1.0, %v3307_v40 }
 0x299   : >> { %v1294_v53 = vadd.f32 1.0, %v3309_v48 }
 0x29a   : >> { %3318 = vrcp.f32 %v1295_v51 }
 0x29b   : >> { %v3311_v54 = vpop.eup %3310  ;;  %3320 = vrcp.f32 %v1294_v53 }
 0x29c   : >> { %v3313_v55 = vpop.eup %3312  ;;  %3322 = vtanh.f32 %v1273_v50  ;;  %v1297_v56 = vadd.f32 1.0, %v3311_v54 }
 0x29d   : >> { %3324 = vtanh.f32 %v1272_v52  ;;  %v1296_v57 = vadd.f32 1.0, %v3313_v55  ;;  %v3315_v58 = vpop.eup %3314  ;;  %v1366_v52 = vpop.permute.xlu0 %1365 }
 0x29e   : >> { %3326 = vrcp.f32 %v1297_v56  ;;  %v3317_v59 = vpop.eup %3316  ;;  %v1361_v55 = vpop.permute.xlu1 %1360 }
 0x29f   : >> { %3328 = vrcp.f32 %v1296_v57 }
 0x2a4   : >> { %v3319_v60 = vpop.eup %3318 }
 0x2a5   : >> { %v3321_v61 = vpop.eup %3320  ;;  %v1307_v62 = vmul.f32 %v3319_v60, %v3315_v58  ;;  %v2646_v60 = vld [vmem:[%s3717_s22 + $0x240] sm:$0xff] (%p763_p1) }
 0x2a6   : >> { %v3323_v63 = vpop.eup %3322  ;;  %v1306_v1 = vmul.f32 %v3321_v61, %v3317_v59  ;;  %2961 = vmatprep.mubr.msk.f32.mxu0 (%p763_p1), %vm805_vm2, %v2646_v60 }
 0x2a7   : >> { %v3325_v2 = vpop.eup %3324 }
 0x2a8   : >> { %v3327_v3 = vpop.eup %3326  ;;  %v3046_v4 = vpack.c.bf16 %v1307_v62, %v1306_v1  ;;  %v2659_v1 = vld [vmem:[%s3717_s22 + $0x2a8] sm:$0xff] (%p763_p1) }
 0x2a9   : >> { %v3329_v5 = vpop.eup %3328  ;;  %v1309_v6 = vmul.f32 %v3327_v3, %v3323_v63  ;;  %v2658_v63 = vld [vmem:[%s3717_s22 + $0x2a0] sm:$0xff] (%p763_p1)  ;;  %v2661_v3 = vld [vmem:[%s3717_s22 + $0x2b8] sm:$0xff] (%p763_p1) }
 0x2aa   : >> { %3047 = vmatprep.subr.bf16.mxu1 %v3046_v4  ;;  %v1308_v7 = vmul.f32 %v3329_v5, %v3325_v2  ;;  %v2660_v2 = vld [vmem:[%s3717_s22 + $0x2b0] sm:$0xff] (%p763_p1)  ;;  %v2698_v5 = vld [vmem:[%s3722_s12 + $0xe0] sm:$0xff] (%p763_p1) }
 0x2ab   : >> { %3049 = vmatpush3.bf16.msra.mxu1 %v3046_v4  ;;  %v2699_v4 = vld [vmem:[%s3722_s12 + $0xe8] sm:$0xff] (%p763_p1) }
 0x2ac   : >> { %v3050_v8 = vpack.c.bf16 %v1309_v6, %v1308_v7  ;;  %v2700_v6 = vld [vmem:[%s3722_s12 + $0xf0] sm:$0xff] (%p763_p1)  ;;  %v2701_v7 = vld [vmem:[%s3722_s12 + $0xf8] sm:$0xff] (%p763_p1) }
 0x2ae   : >> { %3051 = vmatprep.subr.bf16.mxu1 %v3050_v8 }
 0x2af   : >> { %3053 = vmatpush3.bf16.msra.mxu1 %v3050_v8  ;;  %v2694_v8 = vld [vmem:[%s3722_s12 + $0xc0] sm:$0xff] (%p763_p1) }
 0x2b2   : >> { %2922 = vmatmul.mubr.msk.f32.vlgmr.msra.gmra.mrb[8].mxu1 %vm805_vm2, %v1312_v10  ;;  %v2695_v10 = vld [vmem:[%s3722_s12 + $0xc8] sm:$0xff] (%p763_p1) }
 0x2b3   : >> { %2924 = vmatprep.mubr.msk.f32.mxu1 %vm805_vm2, %v1313_v11  ;;  %v2696_v11 = vld [vmem:[%s3722_s12 + $0xd0] sm:$0xff] (%p763_p1) }
 0x2b6   : >> { %2925 = vmatmul.mubr.msk.f32.gmra.mrb[10].mxu1 %vm805_vm2, %v1314_v12  ;;  %v2697_v12 = vld [vmem:[%s3722_s12 + $0xd8] sm:$0xff] (%p763_p1) }
 0x2b7   : >> { %2927 = vmatprep.mubr.msk.f32.mxu1 %vm805_vm2, %v1315_v13  ;;  %v2710_v13 = vld [vmem:[%s3732_s18 + $0xc0] sm:$0xff] (%p763_p1) }
 0x2ba   : >> { %2928 = vmatmul.mubr.msk.f32.gmra.mrb[12].mxu1 %vm805_vm2, %v1316_v14  ;;  %v2711_v14 = vld [vmem:[%s3732_s18 + $0xc8] sm:$0xff] (%p763_p1) }
 0x2bb   : >> { %2930 = vmatprep.mubr.msk.f32.mxu1 %vm805_vm2, %v1317_v15  ;;  %v2712_v15 = vld [vmem:[%s3732_s18 + $0xd0] sm:$0xff] (%p763_p1) }
 0x2be   : >> { %2931 = vmatmul.mubr.msk.f32.gmra.mrb[14].mxu1 %vm805_vm2, %v1318_v16  ;;  %v2713_v16 = vld [vmem:[%s3732_s18 + $0xd8] sm:$0xff] (%p763_p1) }
 0x2bf   : > { %2941 = vmatprep.mubr.msk.f32.mxu1 (%p763_p1), %vm805_vm2, %v2654_v9 }
 0x385   : >> { %v2923_v20 = vpop.f32.mrb[8].mxu1 }
 0x386   : >> { %v1464_v22 = vadd.f32 %v2923_v20, %v1336_v17  ;;  %v1458_v23 = vpop.f32.mrb[9].mxu1  ;;  %v2175_v17 = vld [vmem:[%s3746_s0 + $0x8] sm:$0xff] (%p763_p1) }
 0x387   : >> { %v1459_v24 = vadd.f32 %v1458_v23, %v1331_v18  ;;  %v2174_v18 = vld [vmem:[%s3746_s0] sm:$0xff] (%p763_p1) }
 0x388   : >> { %v1498_v25 = vadd.f32 %v3536_v33, %v1464_v22 }
 0x389   : >> { %v1497_v26 = vadd.f32 %v3540_v36, %v1459_v24  ;;  %v2926_v27 = vpop.f32.mrb[10].mxu1 }
 0x38a   : >> { %v1502_v28 = vmul.f32 %v3702_v0, %v1498_v25   ;;  %v1474_v29 = vadd.f32 %v2926_v27, %v1346_v19  ;;  %v1468_v30 = vpop.f32.mrb[11].mxu1 }
 0x38b   : >> { %v1501_v34 = vmul.f32 %v3702_v0, %v1497_v26   ;;  %v1469_v37 = vadd.f32 %v1468_v30, %v1341_v21 }
 0x38c   : >> { %v1500_v39 = vadd.f32 %v3528_v42, %v1474_v29 }
 0x38d   : >> { %v1499_v40 = vadd.f32 %v3532_v43, %v1469_v37  ;;  %v2929_v41 = vpop.f32.mrb[12].mxu1  ;;  %v3330_v59 = vpack.i.bf16 (%p763_p1), %v1502_v28, %v1501_v34  ;;  %v3054_v62 = vpack.c.bf16 (%p763_p1), %v1502_v28, %v1501_v34 }
 0x38e   : >> { %v1504_v48 = vmul.f32 %v3702_v0, %v1500_v39   ;;  %v1484_v33 = vadd.f32 %v2929_v41, %v1356_v31  ;;  %v1478_v49 = vpop.f32.mrb[13].mxu1  ;;  %v2648_v39 = vld [vmem:[%s3717_s22 + $0x250] sm:$0xff] (%p763_p1)  ;;  %v2649_v41 = vld [vmem:[%s3717_s22 + $0x258] sm:$0xff] (%p763_p1) }
 0x38f   : >> { %v1503_v50 = vmul.f32 %v3702_v0, %v1499_v40   ;;  %v1479_v36 = vadd.f32 %v1478_v49, %v1351_v38  ;;  %3331 = vrot.lane.b32.xlu0 (%p763_p1), %v3330_v59, %s3551_s24  ;;  %3341 = vrot.lane.b32.xlu1 (%p763_p1), %v3330_v59, %s3552_s19  ;;  %v2647_v38 = vld [vmem:[%s3717_s22 + $0x248] sm:$0xff] (%p763_p1)  ;;  %v2652_v49 = vld [vmem:[%s3717_s22 + $0x270] sm:$0xff] (%p763_p1) }
 0x390   : >> { %v3922_v46 = vadd.f32 %v3520_v46, %v1484_v33   ;;  %v4178_v33 = vmov %v1502_v28  ;;  %3055 = vmatprep.subr.bf16.mxu1 (%p763_p1), %v3054_v62  ;;  %v2685_v59 = vld [vmem:[%s3717_s22 + $0x2f8] sm:$0xff] (%p763_p1) }
 0x391   : >> { %v3925_v47 = vadd.f32 %v3524_v47, %v1479_v36   ;;  %v2932_v54 = vpop.f32.mrb[14].mxu1  ;;  %v4179_v36 = vmov %v1501_v34  ;;  %v3335_v61 = vpack.i.bf16 (%p763_p1), %v1504_v48, %v1503_v50  ;;  %3057 = vmatpush3.bf16.msra.mxu1 (%p763_p1), %v3054_v62  ;;  %v2651_v33 = vld [vmem:[%s3717_s22 + $0x268] sm:$0xff] (%p763_p1) }
 0x392   : >> { %v4168_v51 = vmov %v3922_v46  ;;  %v1494_v42 = vadd.f32 %v2932_v54, %v1366_v52  ;;  %v1488_v56 = vpop.f32.mrb[15].mxu1  ;;  %765 = sbr.rel (!%p763_p1) target bundleno = 282 (0x11a), region = 165  ;;  %v2678_v36 = vld [vmem:[%s3717_s22 + $0x2c0] sm:$0xff] (%p763_p1)  ;;  %v2679_v52 = vld [vmem:[%s3717_s22 + $0x2c8] sm:$0xff] (%p763_p1)  ;;  %v2680_v54 = vld [vmem:[%s3717_s22 + $0x2d0] sm:$0xff] (%p763_p1) }
 0x393   : >> { %v4169_v53 = vmov %v3925_v47  ;;  %v1489_v43 = vadd.f32 %v1488_v56, %v1361_v55  ;;  %v4174_v46 = vmov %v4168_v51  ;;  %3336 = vrot.lane.b32.xlu0 (%p763_p1), %v3335_v61, %s3551_s24  ;;  %3346 = vrot.lane.b32.xlu1 (%p763_p1), %v3335_v61, %s3552_s19  ;;  %v2681_v55 = vld [vmem:[%s3717_s22 + $0x2d8] sm:$0xff] (%p763_p1)  ;;  %v2683_v56 = vld [vmem:[%s3717_s22 + $0x2e8] sm:$0xff] (%p763_p1) }
 0x394   : >> { %v3928_v44 = vadd.f32 %v3512_v44, %v1494_v42   ;;  %v4175_v47 = vmov %v4169_v53  ;;  %v4176_v42 = vmov %v1504_v48  ;;  %v2656_v46 = vld [vmem:[%s3717_s22 + $0x290] sm:$0xff] (%p763_p1) }
 0x395   : >> { %v3931_v45 = vadd.f32 %v3516_v45, %v1489_v43   ;;  %v4177_v43 = vmov %v1503_v50  ;;  %v2657_v47 = vld [vmem:[%s3717_s22 + $0x298] sm:$0xff] (%p763_p1)  ;;  %v2682_v42 = vld [vmem:[%s3717_s22 + $0x2e0] sm:$0xff] (%p763_p1) }
 0x396   : >> { %v4170_v57 = vmov %v3928_v44  ;;  %v2684_v43 = vld [vmem:[%s3717_s22 + $0x2f0] sm:$0xff] (%p763_p1) }
 0x397   : >> { %v4171_v58 = vmov %v3931_v45  ;;  %v4172_v44 = vmov %v4170_v57  ;;  %1984 = vperm.xlu1 (%p763_p1), %3351, %v2699_v4   ;;  %1979 = vperm.xlu0 (%p763_p1), %3350, %v2698_v5  }
 0x398   : >> { %v4173_v45 = vmov %v4171_v58  ;;  %v3058_v44 = vpack.c.bf16 (%p763_p1), %v1504_v48, %v1503_v50  ;;  %v2650_v48 = vld [vmem:[%s3717_s22 + $0x260] sm:$0xff] (%p763_p1)  ;;  %v2653_v50 = vld [vmem:[%s3717_s22 + $0x278] sm:$0xff] (%p763_p1) }
 0x399   : > { %v2655_v45 = vld [vmem:[%s3717_s22 + $0x288] sm:$0xff]  ;;  %2289 = vst [vmem:[#allocation2] sm:$0xff] (!%p2720_p2), %v3776_v35 }
 0x39a   : > { %3059 = vmatprep.subr.bf16.mxu1 %v3058_v44 }
 0x39b   : > { %3061 = vmatpush3.bf16.msra.mxu1 %v3058_v44  ;;  %1989 = vperm.xlu1 %3351, %v2700_v6  }
 0x39c   : > { %1994 = vperm.xlu0 %3350, %v2701_v7  }
 0x39e   : > { %2942 = vmatmul.mubr.msk.f32.vlgmr.msra.gmra.mrb[0].mxu1 %vm805_vm2, %v2655_v45 }
 0x39f   : > { %2944 = vmatprep.mubr.msk.f32.mxu1 %vm805_vm2, %v2656_v46  ;;  %1959 = vperm.xlu1 %3351, %v2694_v8  }
 0x3a0   : > { %1964 = vperm.xlu0 %3350, %v2695_v10  }
 0x3a2   : > { %2945 = vmatmul.mubr.msk.f32.gmra.mrb[2].mxu1 %vm805_vm2, %v2657_v47 }
 0x3a3   : > { %2947 = vmatprep.mubr.msk.f32.mxu1 %vm805_vm2, %v2658_v63  ;;  %1969 = vperm.xlu1 %3351, %v2696_v11   ;;  %v2706_v63 = vld [vmem:[%s3727_s17 + $0xc0] sm:$0xff] }
 0x3a4   : > { %1974 = vperm.xlu0 %3350, %v2697_v12  }
 0x3a6   : > { %2948 = vmatmul.mubr.msk.f32.gmra.mrb[4].mxu1 %vm805_vm2, %v2659_v1 }
 0x3a7   : > { %2950 = vmatprep.mubr.msk.f32.mxu1 %vm805_vm2, %v2660_v2  ;;  %2049 = vperm.xlu1 %3351, %v2710_v13  }
 0x3a8   : > { %2054 = vperm.xlu0 %3350, %v2711_v14  }
 0x3aa   : > { %2951 = vmatmul.mubr.msk.f32.gmra.mrb[6].mxu1 %vm805_vm2, %v2661_v3 }
 0x3ab   : > { %2059 = vperm.xlu1 %3351, %v2712_v15   ;;  %3001 = vmatprep.mubr.msk.f32.mxu1 %vm805_vm2, %v2706_v63 }
 0x3ac   : > { %2064 = vperm.xlu0 %3350, %v2713_v16  }
 0x3af   : > { %2183 = vperm.xlu1 %3351, %v2175_v17  }
 0x3b3   : > { %2178 = vperm.xlu1 %3351, %v2174_v18  }
 0x401   : > { %v3332_v19 = vpop.permute.xlu0 %3331  ;;  %v3342_v20 = vpop.permute.xlu1 %3341 }
 0x402   : > { %v3334_v21 = vunpack.i.h.bf16 %v3332_v19  ;;  %v3333_v22 = vunpack.i.l.bf16 %v3332_v19  ;;  %v3344_v24 = vunpack.i.h.bf16 %v3342_v20  ;;  %v3343_v25 = vunpack.i.l.bf16 %v3342_v20 }
 0x404   : > { %v3062_v23 = vpack.c.bf16 %v3334_v21, %v3333_v22  ;;  %v3070_v31 = vpack.c.bf16 %v3344_v24, %v3343_v25 }
 0x405   : > { %v3337_v26 = vpop.permute.xlu0 %3336  ;;  %v3347_v27 = vpop.permute.xlu1 %3346 }
 0x406   : > { %v3339_v28 = vunpack.i.h.bf16 %v3337_v26  ;;  %v3338_v29 = vunpack.i.l.bf16 %v3337_v26  ;;  %3063 = vmatprep.subr.bf16.mxu0 %v3062_v23  ;;  %v3349_v34 = vunpack.i.h.bf16 %v3347_v27  ;;  %v3348_v37 = vunpack.i.l.bf16 %v3347_v27 }
 0x407   : > { %3065 = vmatpush3.bf16.msra.mxu0 %v3062_v23 }
 0x408   : > { %v3066_v30 = vpack.c.bf16 %v3339_v28, %v3338_v29  ;;  %v3074_v40 = vpack.c.bf16 %v3349_v34, %v3348_v37 }
 0x40a   : > { %3067 = vmatprep.subr.bf16.mxu0 %v3066_v30 }
 0x40b   : > { %3069 = vmatpush3.bf16.msra.mxu0 %v3066_v30 }
 0x40c   : > { %3071 = vmatprep.subr.bf16.mxu0 %v3070_v31 }
 0x40e   : > { %2962 = vmatmul.mubr.msk.f32.vlgmr.msra.gmra.mrb[0].mxu0 %vm805_vm2, %v2647_v38 }
 0x40f   : > { %2964 = vmatprep.mubr.msk.f32.mxu0 %vm805_vm2, %v2648_v39  ;;  %3073 = vmatpush3.bf16.msra.mxu0 %v3070_v31 }
 0x410   : > { %3075 = vmatprep.subr.bf16.mxu0 %v3074_v40 }
 0x412   : > { %2965 = vmatmul.mubr.msk.f32.gmra.mrb[2].mxu0 %vm805_vm2, %v2649_v41 }
 0x413   : > { %2967 = vmatprep.mubr.msk.f32.mxu0 %vm805_vm2, %v2650_v48  ;;  %3077 = vmatpush3.bf16.msra.mxu0 %v3074_v40 }
 0x416   : > { %2968 = vmatmul.mubr.msk.f32.gmra.mrb[4].mxu0 %vm805_vm2, %v2651_v33  ;;  %v1980_v10 = vpop.permute.xlu0 %1979  ;;  %v1985_v11 = vpop.permute.xlu1 %1984 }
 0x417   : > { %2970 = vmatprep.mubr.msk.f32.mxu0 %vm805_vm2, %v2652_v49 }
 0x41a   : > { %2971 = vmatmul.mubr.msk.f32.gmra.mrb[6].mxu0 %vm805_vm2, %v2653_v50  ;;  %v1990_v23 = vpop.permute.xlu1 %1989 }
 0x41b   : > { %2981 = vmatprep.mubr.msk.f32.mxu0 %vm805_vm2, %v2678_v36  ;;  %v1995_v19 = vpop.permute.xlu0 %1994 }
 0x41e   : > { %2982 = vmatmul.mubr.msk.f32.vlgmr.msra.gmra.mrb[0].mxu0 %vm805_vm2, %v2679_v52  ;;  %v1960_v31 = vpop.permute.xlu1 %1959 }
 0x41f   : > { %2984 = vmatprep.mubr.msk.f32.mxu0 %vm805_vm2, %v2680_v54  ;;  %v1965_v30 = vpop.permute.xlu0 %1964 }
 0x422   : > { %2985 = vmatmul.mubr.msk.f32.gmra.mrb[2].mxu0 %vm805_vm2, %v2681_v55  ;;  %v1970_v41 = vpop.permute.xlu1 %1969 }
 0x423   : > { %2987 = vmatprep.mubr.msk.f32.mxu0 %vm805_vm2, %v2682_v42  ;;  %v1975_v39 = vpop.permute.xlu0 %1974 }
 0x426   : > { %2988 = vmatmul.mubr.msk.f32.gmra.mrb[4].mxu0 %vm805_vm2, %v2683_v56 }
 0x427   : > { %2990 = vmatprep.mubr.msk.f32.mxu0 %vm805_vm2, %v2684_v43 }
 0x42a   : > { %2991 = vmatmul.mubr.msk.f32.gmra.mrb[6].mxu0 %vm805_vm2, %v2685_v59 }
 0x471   : > { %v2943_v60 = vpop.f32.mrb[0].mxu1 }
 0x472   : > { %v1626_v61 = vpop.f32.mrb[1].mxu1 }
 0x475   : > { %v2946_v62 = vpop.f32.mrb[2].mxu1 }
 0x476   : > { %v1636_v44 = vpop.f32.mrb[3].mxu1 }
 0x479   : > { %v2949_v9 = vpop.f32.mrb[4].mxu1 }
 0x47a   : > { %v1646_v45 = vpop.f32.mrb[5].mxu1 }
 0x47d   : > { %v2952_v46 = vpop.f32.mrb[6].mxu1 }
 0x47e   : > { %v1656_v47 = vpop.f32.mrb[7].mxu1 }
 0x4f1   : > { %v2983_v1 = vpop.f32.mrb[0].mxu0 }
 0x4f2   : > { %v3112_v2 = vadd.f32 %v2983_v1, %v2943_v60  ;;  %v1901_v3 = vpop.f32.mrb[1].mxu0 }
 0x4f3   : > { %v3113_v4 = vadd.f32 %v1901_v3, %v1626_v61  ;;  %v2708_v3 = vld [vmem:[%s3727_s17 + $0xd0] sm:$0xff] }
 0x4f4   : > { %v1998_v34 = vadd.f32 %v3112_v2, %v1965_v30  ;;  %v2707_v2 = vld [vmem:[%s3727_s17 + $0xc8] sm:$0xff] }
 0x4f5   : > { %v2986_v5 = vpop.f32.mrb[2].mxu0  ;;  %v1997_v37 = vadd.f32 %v3113_v4, %v1960_v31  ;;  %v2709_v4 = vld [vmem:[%s3727_s17 + $0xd8] sm:$0xff] }
 0x4f6   : > { %v3114_v6 = vadd.f32 %v2986_v5, %v2946_v62  ;;  %v1911_v7 = vpop.f32.mrb[3].mxu0  ;;  %v2172_v5 = vld [vmem:[%s3741_s23] sm:$0xff] }
 0x4f7   : > { %v3115_v8 = vadd.f32 %v1911_v7, %v1636_v44  ;;  %v2050_v7 = vpop.permute.xlu1 %2049 }
 0x4f8   : > { %v2000_v48 = vadd.f32 %v3114_v6, %v1975_v39  ;;  %v2055_v6 = vpop.permute.xlu0 %2054 }
 0x4f9   : > { %v2989_v12 = vpop.f32.mrb[4].mxu0  ;;  %v1999_v49 = vadd.f32 %v3115_v8, %v1970_v41 }
 0x4fa   : > { %v3116_v13 = vadd.f32 %v2989_v12, %v2949_v9  ;;  %v1921_v14 = vpop.f32.mrb[5].mxu0 }
 0x4fb   : > { %v3117_v15 = vadd.f32 %v1921_v14, %v1646_v45 }
 0x4fc   : > { %v2002_v16 = vadd.f32 %v3116_v13, %v1985_v11  ;;  %v2065_v14 = vpop.permute.xlu0 %2064 }
 0x4fd   : > { %v2001_v17 = vadd.f32 %v3117_v15, %v1980_v10  ;;  %v2992_v18 = vpop.f32.mrb[6].mxu0 }
 0x4fe   : > { %v2703_v20 = vmul.f32 -1.442695, %v2002_v16  ;;  %v3118_v21 = vadd.f32 %v2992_v18, %v2952_v46  ;;  %v1931_v22 = vpop.f32.mrb[7].mxu0 }
 0x4ff   : > { %v2702_v24 = vmul.f32 -1.442695, %v2001_v17  ;;  %v3119_v25 = vadd.f32 %v1931_v22, %v1656_v47  ;;  %v2060_v17 = vpop.permute.xlu1 %2059 }
 0x500   : > { %3352 = vpow2.f32 %v2703_v20  ;;  %v2004_v26 = vadd.f32 %v3118_v21, %v1995_v19 }
 0x501   : > { %3354 = vpow2.f32 %v2702_v24  ;;  %v2003_v27 = vadd.f32 %v3119_v25, %v1990_v23 }
 0x502   : > { %v2705_v28 = vmul.f32 -1.442695, %v2004_v26 }
 0x503   : > { %v2704_v29 = vmul.f32 -1.442695, %v2003_v27  ;;  %v2173_v27 = vld [vmem:[%s3741_s23 + $0x8] sm:$0xff] }
 0x504   : > { %3356 = vpow2.f32 %v2705_v28  ;;  %v2184_v28 = vpop.permute.xlu1 %2183 }
 0x505   : > { %3358 = vpow2.f32 %v2704_v29 }
 0x506   : > { %3360 = vtanh.f32 %v1998_v34 }
 0x507   : > { %3362 = vtanh.f32 %v1997_v37 }
 0x508   : > { %v2179_v37 = vpop.permute.xlu1 %2178 }
 0x50a   : > { %v3353_v38 = vpop.eup %3352 }
 0x50b   : > { %v3355_v40 = vpop.eup %3354  ;;  %v2022_v33 = vadd.f32 1.0, %v3353_v38 }
 0x50c   : > { %v2021_v50 = vadd.f32 1.0, %v3355_v40 }
 0x50d   : > { %3364 = vrcp.f32 %v2022_v33 }
 0x50e   : > { %v3357_v36 = vpop.eup %3356  ;;  %3366 = vrcp.f32 %v2021_v50 }
 0x50f   : > { %v3359_v52 = vpop.eup %3358  ;;  %3368 = vtanh.f32 %v2000_v48  ;;  %v2024_v54 = vadd.f32 1.0, %v3357_v36 }
 0x510   : > { %3370 = vtanh.f32 %v1999_v49  ;;  %v2023_v55 = vadd.f32 1.0, %v3359_v52  ;;  %v3361_v42 = vpop.eup %3360 }
 0x511   : > { %3372 = vrcp.f32 %v2024_v54  ;;  %v3363_v56 = vpop.eup %3362  ;;  %v2272_v54 = vld [vmem:[#allocation3] sm:$0x1] }
 0x512   : > { %3374 = vrcp.f32 %v2023_v55 }
 0x517   : > { %v3365_v43 = vpop.eup %3364 }
 0x518   : > { %v3367_v59 = vpop.eup %3366  ;;  %v2034_v60 = vmul.f32 %v3365_v43, %v3361_v42 }
 0x519   : > { %v3369_v61 = vpop.eup %3368  ;;  %v2033_v62 = vmul.f32 %v3367_v59, %v3363_v56 }
 0x51a   : > { %v3371_v44 = vpop.eup %3370 }
 0x51b   : > { %v3373_v9 = vpop.eup %3372  ;;  %v3078_v45 = vpack.c.bf16 %v2034_v60, %v2033_v62 }
 0x51c   : > { %v3375_v46 = vpop.eup %3374  ;;  %v2036_v47 = vmul.f32 %v3373_v9, %v3369_v61 }
 0x51d   : > { %3079 = vmatprep.subr.bf16.mxu1 %v3078_v45  ;;  %v2035_v63 = vmul.f32 %v3375_v46, %v3371_v44 }
 0x51e   : > { %3081 = vmatpush3.bf16.msra.mxu1 %v3078_v45 }
 0x51f   : > { %v3082_v1 = vpack.c.bf16 %v2036_v47, %v2035_v63 }
 0x521   : > { %3083 = vmatprep.subr.bf16.mxu1 %v3082_v1 }
 0x522   : > { %3085 = vmatpush3.bf16.msra.mxu1 %v3082_v1 }
 0x525   : > { %3002 = vmatmul.mubr.msk.f32.vlgmr.msra.gmra.mrb[8].mxu1 %vm805_vm2, %v2707_v2 }
 0x526   : > { %3004 = vmatprep.mubr.msk.f32.mxu1 %vm805_vm2, %v2708_v3 }
 0x529   : > { %3005 = vmatmul.mubr.msk.f32.gmra.mrb[10].mxu1 %vm805_vm2, %v2709_v4 }
 0x52a   : > { %3015 = vmatprep.mubr.msk.f32.mxu1 %vm805_vm2, %v2172_v5 }
 0x5f8   : > { %v3003_v8 = vpop.f32.mrb[8].mxu1 }
 0x5f9   : > { %v2151_v10 = vadd.f32 %v3003_v8, %v2055_v6  ;;  %v2145_v11 = vpop.f32.mrb[9].mxu1 }
 0x5fa   : > { %v2146_v12 = vadd.f32 %v2145_v11, %v2050_v7 }
 0x5fb   : > { %v2165_v13 = vadd.f32 %v2151_v10, %v4168_v51 }
 0x5fc   : > { %v2164_v15 = vadd.f32 %v2146_v12, %v4169_v53  ;;  %v3006_v16 = vpop.f32.mrb[10].mxu1 }
 0x5fd   : > { %v2169_v18 = vmul.f32 %v3702_v0, %v2165_v13  ;;  %v2161_v19 = vadd.f32 %v3006_v16, %v2065_v14  ;;  %v2155_v20 = vpop.f32.mrb[11].mxu1 }
 0x5fe   : > { %v2168_v21 = vmul.f32 %v3702_v0, %v2164_v15  ;;  %v2156_v22 = vadd.f32 %v2155_v20, %v2060_v17 }
 0x5ff   : > { %v2167_v23 = vadd.f32 %v2161_v19, %v4170_v57 }
 0x600   : > { %v3086_v24 = vpack.c.bf16 %v2169_v18, %v2168_v21  ;;  %v2166_v25 = vadd.f32 %v2156_v22, %v4171_v58 }
 0x601   : > { %v2171_v51 = vmul.f32 %v3702_v0, %v2167_v23 }
 0x602   : > { %v2170_v26 = vmul.f32 %v3702_v0, %v2166_v25  ;;  %3087 = vmatprep.subr.bf16.mxu1 %v3086_v24 }
 0x603   : > { %3089 = vmatpush3.bf16.msra.mxu1 %v3086_v24 }
 0x604   : > { %v3090_v53 = vpack.c.bf16 %v2171_v51, %v2170_v26 }
 0x606   : > { %3091 = vmatprep.subr.bf16.mxu1 %v3090_v53 }
 0x607   : > { %3093 = vmatpush3.bf16.msra.mxu1 %v3090_v53 }
 0x60a   : > { %3016 = vmatmul.mubr.msk.f32.vlgmr.msra.gmra.mrb[12].mxu1 %vm805_vm2, %v2173_v27 }
 0x6dd   : > { %v3017_v29 = vpop.f32.mrb[12].mxu1 }
 0x6de   : > { %v2264_v30 = vadd.f32 %v3017_v29, %v2184_v28  ;;  %v2258_v31 = vpop.f32.mrb[13].mxu1 }
 0x6df   : > { %v2259_v38 = vadd.f32 %v2258_v31, %v2179_v37 }
 0x6e0   : > { %v2267_v57 = vmul.f32 1.442695, %v2264_v30  ;;  %v2273_v34 = vmul.f32 %v3702_v0, %v2264_v30 }
 0x6e2   : > { %3376 = vpow2.f32 %v2267_v57  ;;  %2274 = vadd.xlane.f32.xlu0 %v2273_v34 }
 0x6ec   : > { %v3377_v58 = vpop.eup %3376 }
 0x6ed   : > { %v2269_v39 = vmul.f32 %v3377_v58, %v3772_v32 }
 0x6ef   : > { %v2270_v40 = vadd.f32 %v2269_v39, %v2259_v38 }
 0x6f1   : > { %v2271_v41 = vmul.f32 %v3702_v0, %v2270_v40 }
 0x6f3   : > { %2290 = vst [vmem:[#allocation2 + $0x8] sm:$0xff] (!%p2720_p2), %v2271_v41 }
 0x76f   : > { %v2275_v48 = vpop.xlane.xlu0 %2274 }
 0x770   : > { %v2276_v33 = vrot.slane %v2275_v48, 4 }
 0x772   : > { %v2277_v49 = vadd.f32 %v2276_v33, %v2275_v48 }
 0x774   : > { %v2278_v50 = vrot.slane %v2277_v49, 2 }
 0x776   : > { %v2279_v36 = vadd.f32 %v2278_v50, %v2277_v49 }
 0x778   : > { %v2280_v52 = vrot.slane %v2279_v36, 1  ;;  %2288 = sbr.rel (%p2720_p2) target bundleno = 1919 (0x77f), region = 75 }
 0x77a   : > { %v2281_v55 = vadd.f32 %v2280_v52, %v2279_v36 }
 0x77c   : > { %v2282_v42 = vadd.f32 %v2281_v55, %v2272_v54 }
 0x77e   : > { %2284 = vst.msk [vmem:[#allocation3] sm:$0x1] %vm2283_vm3, %v2282_v42 }
 0x77f PF: > { %p2721_p4 = scmp.ne.s32.totalorder %s3492_s20, 1 }
 0x780   : > { %2295 = vst [vmem:[%s3748_s1] sm:$0xff] (!%p2721_p4), %v3776_v35  ;;  %2296 = vst [vmem:[%s3748_s1 + $0x8] sm:$0xff] (!%p2721_p4), %v2271_v41 }
 0x781   : > { %2294 = sbr.rel (%p2721_p4) target bundleno = 1928 (0x788), region = 79 }
 0x785   : > { %v2297_v0 = vld [vmem:[#allocation3] sm:$0x1] (!%p2721_p4) }
 0x786   : > { %2298 = vst.msk [vmem:[%s579_s15] sm:$0x1] (!%p2721_p4), %vm2283_vm3, %v2297_v0 }
 0x788 PF: > { %s4180_s17 = sld [smem:[#allocation10_spill]]  ;;  %s4183_s23 = sld [smem:[#allocation24_spill]] }
 0x789   : > { %s4181_s18 = sld [smem:[#allocation8_spill]]  ;;  %s2316_s2 = sshll.u32 %s3748_s1, 4  ;;  %s4061_s2 = int_to_ptr.vmem [resolvable:$true] %s2316_s2 }
 0x78a   : > { %s3378_s15 = scalar_lea.vmem %s4061_s2, 256  ;;  %s3553_s4 = smov [#allocation4]  }
 0x78b   : > { %p3379_p5 = scmp.ne.s32.totalorder %s4061_s2, %s3378_s15  ;;  %s3382_s10 = sshll.u32 %s3553_s4, 4  ;;  %s3383_s10 = int_to_ptr.vmem [resolvable:$false] %s3382_s10 }
 0x78c   : > { %s3384_s21 = scalar_lea.vmem %s3383_s10, 512  ;;  %p3385_p8 = scmp.lt.s32.totalorder %s4061_s2, %s3383_s10 }
 0x78d   : > { %p3380_p6 = pnand %p3379_p5, %p3665_p3  ;;  %p3386_p10 = scmp.lt.s32.totalorder %s3384_s21, %s3378_s15 }
 0x78e   : > { %s2733_s28 = sshll.u32 %s4180_s17, 8  ;;  %s4184_s27 = smov %s4183_s23 }
 0x78f   : > { %s4058_s0 = scalar_lea.hbm %s4183_s23, %s2733_s28  ;;  %s4185_s3 = sand.u32 1, %s4181_s18  }
 0x790   : > { %s4065_s25 = scalar_lea.sflag [#allocation5], %s4185_s3  ;;  %p3381_p7 = pneg %p3380_p6 }
 0x791   : > { %p3387_p11 = por %p3386_p10, %p3385_p8 }
 0x793   : > { %p3388_p12 = pnand %p3387_p11, %p3381_p7 }
 0x795   : > { %3391 = shalt.err (!%p3388_p12)
}
 0x796   : > { %s3392_s1 = scalar_lea.hbm %s4058_s0, 256  ;;  %s3396_s16 = scalar_lea.hbm %s4184_s27, 512 }
 0x797   : > { %p3393_p13 = scmp.ne.s32.totalorder %s4058_s0, %s3392_s1  ;;  %p3397_p2 = scmp.lt.u32.totalorder %s4058_s0, %s4184_s27 }
 0x798   : > { %p3398_p4 = scmp.lt.u32.totalorder %s3396_s16, %s3392_s1  ;;  %p3400_p6 = scmp.lt.u32.totalorder %s3392_s1, %s4058_s0 }
 0x799   : > { %p3394_p0 = pnand %p3393_p13, %p3665_p3 }
 0x79a   : > { %p3399_p5 = por %p3398_p4, %p3397_p2 }
 0x79b   : > { %p3395_p1 = pneg %p3394_p0 }
 0x79c   : > { %p3401_p7 = por %p3400_p6, %p3399_p5 }
 0x79e   : > { %p3402_p8 = pnand %p3401_p7, %p3395_p1 }
 0x7a0   : > { %3405 = shalt.err (!%p3402_p8)
}
 0x7a1   : > { %s3554_s19 = smov 128   ;;  %s3555_s22 = smov 8  }
 0x7a2   : > { %3130 = dma.vmem_to_hbm [thread:$0]  (%p3665_p3), %s4061_s2, 256, %s4058_s0, %s4065_s25, %s3554_s19, %s3554_s19, %s3555_s22  }
 0x7a3 PF: > { %s4186_s12 = sld [smem:[#allocation13_spill]]  ;;  %s4187_s17 = sld [smem:[#allocation7_spill]] }
 0x7a9   : > { %p3136_p10 = scmp.ge.s32.totalorder %s4186_s12, 2  ;;  %s2334_s28 = sand.u32 1, %s4187_s17  }
 0x7aa   : > { %s2335_s20 = scalar_lea.sflag [#allocation5], %s2334_s28 }
 0x7ab   : > { %p3133_p11 = pnand %p3136_p10, %p3675_p9 }
 0x7ad   : > { %3475 = dma.done.wait (!%p3133_p11), %s2335_s20, 256  }
 0x7ae   : > { %3477 = vsyncadd (!%p3133_p11), %s2335_s20, 4294967040  ;;  %s25_s24 = sadd.s32 1, %s4186_s12   ;;  %s4189_s17 = sld [smem:[#allocation8_spill]] }
 0x7af   : > { %p22_p12 = scmp.ge.s32.totalorder %s25_s24, 6   ;;  %s4190_s18 = sld [smem:[#allocation9_spill]] }
 0x7b0   : > { %s4191_s19 = sld [smem:[#allocation18_spill]]  ;;  %s4192_s20 = sld [smem:[#allocation11_spill]] }
 0x7b1   : > { %s4193_s21 = sld [smem:[#allocation12_spill]]  ;;  %s4194_s22 = sld [smem:[#allocation14_spill]] }
 0x7b2   : > { %s4195_s23 = sld [smem:[#allocation16_spill]]  ;;  %24 = sbr.rel (!%p22_p12) target bundleno = 12 (0xc), region = 176 }
 0x7b9   :  { %2346 = vsyncpa [#allocation5], 1 }
 0x7ba   :  { %2348 = vsyncpa [#allocation5 + $0x1], 1 }

</bundles_post_ra>
